<compile_context>
chip_gen: v7x
topology: tpu7x:2x2x1
jax: 0.10.0
libtpu: 0.0.40
codegen_flags: <defaults>
</compile_context>

<pallas_src>
import functools

import jax
import jax.numpy as jnp
from jax.experimental import pallas as pl
from jax.experimental.pallas import tpu as pltpu


# ---------------------------------------------------------------------------
# Pallas kernel: full diffusion loop in-kernel (grid=(1,), P2 scalar prefetch
# for the noise schedule, latent resident in VMEM scratch).
# ---------------------------------------------------------------------------
def _denoise_kernel(sqrt_a_ref, sqrt_1ma_ref,            # scalar prefetch: schedules (SMEM)
                    init_ref, noise_ref, mask_ref,       # (C_lat, N), (C_lat, N), (1, N)
                    cond_c_ref, cond_u_ref,              # (H, 1) hoisted text conditioning
                    w1_ref, b1_ref, w2_ref, b2_ref,      # denoiser weights, (out, in) orient
                    wdec_ref, bdec_ref,                  # decoder weights (C_img, C_lat)
                    img_ref,                             # output (C_img, N)
                    lat_ref,                             # VMEM scratch latent (C_lat, N)
                    *, guidance_scale):
    steps = sqrt_a_ref.shape[0] - 1                      # static trip count

    # loop-invariant loads hoisted out of the timestep loop
    init = init_ref[...]
    noise = noise_ref[...]
    m = mask_ref[...]
    w1 = w1_ref[...]
    b1 = b1_ref[...]
    w2 = w2_ref[...]
    b2 = b2_ref[...]
    cond_c = cond_c_ref[...]
    cond_u = cond_u_ref[...]
    g = jnp.float32(guidance_scale)

    # strength = 1.0 -> the reverse process starts from pure noise
    lat_ref[...] = noise

    def step(t, carry):
        lat = lat_ref[...]
        sa_t = sqrt_a_ref[t]
        s1a_t = sqrt_1ma_ref[t]
        sa_n = sqrt_a_ref[t + 1]
        s1a_n = sqrt_1ma_ref[t + 1]

        # shared first-layer projection (computed once per step, not per branch)
        base = jnp.dot(w1, lat, preferred_element_type=jnp.float32) + b1   # (H, N)
        h_c = jnp.tanh(base + cond_c)
        h_u = jnp.tanh(base + cond_u)
        # classifier-free guidance blended BEFORE the linear second layer
        # (exact because layer 2 is linear; b2 is added once afterwards)
        h = h_u + g * (h_c - h_u)
        eps = jnp.dot(w2, h, preferred_element_type=jnp.float32) + b2      # (C_lat, N)

        # DDIM-style update with x0 clipping
        x0 = (lat - s1a_t * eps) / sa_t
        x0 = jnp.clip(x0, -1.0, 1.0)
        lat_next = sa_n * x0 + s1a_n * eps

        # inpainting composite: the known region (mask == 0) is pinned to the
        # correctly-noised original latent; only the masked hole is generated.
        noised_init = sa_n * init + s1a_n * noise
        lat_ref[...] = m * lat_next + (1.0 - m) * noised_init
        return carry

    jax.lax.fori_loop(0, steps, step, 0, unroll=True)

    # fake VAE decode: per-pixel linear map latent channels -> RGB (lane-dense)
    dec = jnp.dot(wdec_ref[...], lat_ref[...],
                  preferred_element_type=jnp.float32) + bdec_ref[...]
    img_ref[...] = jax.nn.sigmoid(dec)


def _diffusion_loop(sqrt_a, sqrt_1ma, init_lat, noise, mask_flat,
                    cond_c, cond_u, params_t, guidance_scale):
    c_lat, n = init_lat.shape
    c_img = params_t["wdec"].shape[0]

    def full(shape):
        # whole-array block, constant across the (single) grid step
        return pl.BlockSpec(shape, lambda i, *_: (0,) * len(shape))

    kernel = functools.partial(_denoise_kernel,
                               guidance_scale=float(guidance_scale))

    inputs = (init_lat, noise, mask_flat, cond_c, cond_u,
              params_t["w1"], params_t["b1"], params_t["w2"], params_t["b2"],
              params_t["wdec"], params_t["bdec"])

    img_flat = pl.pallas_call(
        kernel,
        out_shape=jax.ShapeDtypeStruct((c_img, n), jnp.float32),
        grid_spec=pltpu.PrefetchScalarGridSpec(
            num_scalar_prefetch=2,                 # sqrt(a), sqrt(1-a) -> SMEM
            grid=(1,),                             # timestep loop lives in-kernel
            in_specs=[full(x.shape) for x in inputs],
            out_specs=full((c_img, n)),
            scratch_shapes=[pltpu.VMEM((c_lat, n), jnp.float32)]),
        compiler_params=pltpu.CompilerParams(
            dimension_semantics=("arbitrary",)),
    )(sqrt_a, sqrt_1ma, *inputs)
    return img_flat


# ---------------------------------------------------------------------------
# Glue: deterministic synthetic parameters, fake text encoder / VAE.
# ---------------------------------------------------------------------------
def init_params(key, c_lat=4, hidden=32, txt=32, c_img=3):
    ks = jax.random.split(key, 6)
    rnd = lambda k, shape, s: s * jax.random.normal(k, shape, dtype=jnp.float32)
    return dict(
        enc_w=rnd(ks[0], (c_img, c_lat), 0.5),       # fake VAE encoder projection
        w1=rnd(ks[1], (c_lat, hidden), 0.5),
        wt=rnd(ks[2], (txt, hidden), 0.3),
        b1=jnp.zeros((1, hidden), jnp.float32),
        w2=rnd(ks[3], (hidden, c_lat), 0.3),
        b2=jnp.zeros((1, c_lat), jnp.float32),
        wdec=rnd(ks[4], (c_lat, c_img), 0.5),        # fake VAE decoder projection
        bdec=jnp.zeros((1, c_img), jnp.float32),
    )


def _text_embed(text, dim, base_key):
    # TODO(synk): real CLIP text encoder has no clean Pallas equivalent here;
    # use a deterministic prompt-seeded embedding instead.
    code = sum(ord(c) for c in text) if text else 0
    key = jax.random.fold_in(base_key, code)
    return jax.random.normal(key, (1, dim), dtype=jnp.float32)


def inpainting_forward(params, prompt, image, mask, negative_prompt,
                       steps=50, guidance_scale=7.5, num_samples=1, seed=0):
    """image: (B, 3, H, W) float in [0, 1];  mask: (B, 1, H, W), 1 = inpaint region."""
    # TODO(synk): num_samples > 1 (batch replication of latents) not implemented.
    b, c_img, h, w = image.shape
    hl, wl = h // 2, w // 2                                 # latent resolution
    n = b * hl * wl

    # fake VAE encode: 2x2 average pool + channel projection; transpose to the
    # lane-dense (C, N) layout (spatial axis N = 256 = 2x128 on lanes).
    img_nhwc = jnp.transpose(image, (0, 2, 3, 1))
    img_ds = img_nhwc.reshape(b, hl, 2, wl, 2, c_img).mean(axis=(2, 4))
    init_lat = jnp.tanh(img_ds.reshape(n, c_img) @ params["enc_w"]).T      # (c_lat, N)

    mask_nhwc = jnp.transpose(mask, (0, 2, 3, 1))
    mask_ds = mask_nhwc.reshape(b, hl, 2, wl, 2, 1).max(axis=(2, 4))
    mask_flat = mask_ds.reshape(n, 1).astype(jnp.float32).T                # (1, N)

    txt_key = jax.random.PRNGKey(17)
    emb_c = _text_embed(prompt, params["wt"].shape[0], txt_key)
    emb_u = _text_embed(negative_prompt, params["wt"].shape[0], txt_key)
    # loop-invariant text conditioning, hoisted out of the kernel: (H, 1)
    cond_c = (emb_c @ params["wt"]).T
    cond_u = (emb_u @ params["wt"]).T

    # generator = torch.Generator(...).manual_seed(seed)
    noise = jax.random.normal(jax.random.PRNGKey(seed), init_lat.shape,
                              dtype=jnp.float32)

    # cosine alpha_bar schedule; sqrt terms precomputed on the host and
    # scalar-prefetched into SMEM (no per-step sqrt in the kernel).
    ts = jnp.linspace(0.98, 0.0, steps + 1, dtype=jnp.float32)
    alphas = jnp.cos(ts * (jnp.pi / 2.0)) ** 2
    sqrt_a = jnp.sqrt(alphas).astype(jnp.float32)
    sqrt_1ma = jnp.sqrt(1.0 - alphas).astype(jnp.float32)

    # weights pre-transposed into the (out_channels, in_channels) orientation
    # so every in-kernel matmul is (out, in) @ (in, N) -> (out, N) lane-dense.
    params_t = dict(
        w1=params["w1"].T,        # (hidden, c_lat)
        b1=params["b1"].T,        # (hidden, 1)
        w2=params["w2"].T,        # (c_lat, hidden)
        b2=params["b2"].T,        # (c_lat, 1)
        wdec=params["wdec"].T,    # (c_img, c_lat)
        bdec=params["bdec"].T,    # (c_img, 1)
    )

    img_flat = _diffusion_loop(sqrt_a, sqrt_1ma, init_lat, noise, mask_flat,
                               cond_c, cond_u, params_t, guidance_scale)

    out = img_flat.T.reshape(b, hl, wl, 3)
    out = jnp.repeat(jnp.repeat(out, 2, axis=1), 2, axis=2)   # upsample back to input H, W
    return jnp.transpose(out, (0, 3, 1, 2))                   # NCHW like the input


if __name__ == "__main__":
    key = jax.random.PRNGKey(0)
    params = init_params(key)

    k_img, _ = jax.random.split(key)
    image = jax.random.uniform(k_img, (1, 3, 32, 32), dtype=jnp.float32)
    yy, xx = jnp.meshgrid(jnp.arange(32), jnp.arange(32), indexing="ij")
    hole = ((yy >= 8) & (yy < 24) & (xx >= 8) & (xx < 24)).astype(jnp.float32)
    mask = hole[None, None, :, :]

    out = inpainting_forward(params,
                             prompt="a red fox sitting in the snow",
                             image=image,
                             mask=mask,
                             negative_prompt="blurry, low quality",
                             steps=8, guidance_scale=7.5,
                             num_samples=1, seed=0)
    out = jax.block_until_ready(out)
    assert out.shape == (1, 3, 32, 32), out.shape
    assert bool(jnp.all(jnp.isfinite(out)))
    print("KERNEL_OK")
</pallas_src>

<mosaic_0001>
module attributes {stable_mosaic.version = 11 : i64} {
  func.func @_denoise_kernel(%arg0: i32, %arg1: memref<9xf32, #tpu.memory_space<smem>>, %arg2: memref<9xf32, #tpu.memory_space<smem>>, %arg3: memref<4x256xf32, #tpu.memory_space<vmem>>, %arg4: memref<4x256xf32, #tpu.memory_space<vmem>>, %arg5: memref<1x256xf32, #tpu.memory_space<vmem>>, %arg6: memref<32x1xf32, #tpu.memory_space<vmem>>, %arg7: memref<32x1xf32, #tpu.memory_space<vmem>>, %arg8: memref<32x4xf32, #tpu.memory_space<vmem>>, %arg9: memref<32x1xf32, #tpu.memory_space<vmem>>, %arg10: memref<4x32xf32, #tpu.memory_space<vmem>>, %arg11: memref<4x1xf32, #tpu.memory_space<vmem>>, %arg12: memref<3x4xf32, #tpu.memory_space<vmem>>, %arg13: memref<3x1xf32, #tpu.memory_space<vmem>>, %arg14: memref<3x256xf32, #tpu.memory_space<vmem>>, %arg15: memref<4x256xf32, #tpu.memory_space<vmem>>) attributes {dimension_semantics = [#tpu.dimension_semantics<arbitrary>], iteration_bounds = array<i64: 1>, scalar_prefetch = 2 : i64, scratch_operands = 1 : i64, tpu.core_type = #tpu.core_type<tc>, window_params = [{pipeline_mode = #tpu.pipeline_mode<synchronous>, transform_indices = @transform_0, window_bounds = array<i64: 4, 256>}, {pipeline_mode = #tpu.pipeline_mode<synchronous>, transform_indices = @transform_1, window_bounds = array<i64: 4, 256>}, {pipeline_mode = #tpu.pipeline_mode<synchronous>, transform_indices = @transform_2, window_bounds = array<i64: 1, 256>}, {pipeline_mode = #tpu.pipeline_mode<synchronous>, transform_indices = @transform_3, window_bounds = array<i64: 32, 1>}, {pipeline_mode = #tpu.pipeline_mode<synchronous>, transform_indices = @transform_4, window_bounds = array<i64: 32, 1>}, {pipeline_mode = #tpu.pipeline_mode<synchronous>, transform_indices = @transform_5, window_bounds = array<i64: 32, 4>}, {pipeline_mode = #tpu.pipeline_mode<synchronous>, transform_indices = @transform_6, window_bounds = array<i64: 32, 1>}, {pipeline_mode = #tpu.pipeline_mode<synchronous>, transform_indices = @transform_7, window_bounds = array<i64: 4, 32>}, {pipeline_mode = #tpu.pipeline_mode<synchronous>, transform_indices = @transform_8, window_bounds = array<i64: 4, 1>}, {pipeline_mode = #tpu.pipeline_mode<synchronous>, transform_indices = @transform_9, window_bounds = array<i64: 3, 4>}, {pipeline_mode = #tpu.pipeline_mode<synchronous>, transform_indices = @transform_10, window_bounds = array<i64: 3, 1>}, {pipeline_mode = #tpu.pipeline_mode<synchronous>, transform_indices = @transform_11, window_bounds = array<i64: 3, 256>}]} {
    %c0 = arith.constant 0 : index
    %c0_0 = arith.constant 0 : index
    %0 = vector.load %arg3[%c0, %c0_0] : memref<4x256xf32, #tpu.memory_space<vmem>>, vector<4x256xf32>
    %c0_1 = arith.constant 0 : index
    %c0_2 = arith.constant 0 : index
    %1 = vector.load %arg4[%c0_1, %c0_2] : memref<4x256xf32, #tpu.memory_space<vmem>>, vector<4x256xf32>
    %c0_3 = arith.constant 0 : index
    %c0_4 = arith.constant 0 : index
    %2 = vector.load %arg5[%c0_3, %c0_4] : memref<1x256xf32, #tpu.memory_space<vmem>>, vector<1x256xf32>
    %c0_5 = arith.constant 0 : index
    %c0_6 = arith.constant 0 : index
    %3 = vector.load %arg8[%c0_5, %c0_6] : memref<32x4xf32, #tpu.memory_space<vmem>>, vector<32x4xf32>
    %c0_7 = arith.constant 0 : index
    %c0_8 = arith.constant 0 : index
    %4 = vector.load %arg9[%c0_7, %c0_8] : memref<32x1xf32, #tpu.memory_space<vmem>>, vector<32x1xf32>
    %c0_9 = arith.constant 0 : index
    %c0_10 = arith.constant 0 : index
    %5 = vector.load %arg10[%c0_9, %c0_10] : memref<4x32xf32, #tpu.memory_space<vmem>>, vector<4x32xf32>
    %c0_11 = arith.constant 0 : index
    %c0_12 = arith.constant 0 : index
    %6 = vector.load %arg11[%c0_11, %c0_12] : memref<4x1xf32, #tpu.memory_space<vmem>>, vector<4x1xf32>
    %c0_13 = arith.constant 0 : index
    %c0_14 = arith.constant 0 : index
    %7 = vector.load %arg6[%c0_13, %c0_14] : memref<32x1xf32, #tpu.memory_space<vmem>>, vector<32x1xf32>
    %c0_15 = arith.constant 0 : index
    %c0_16 = arith.constant 0 : index
    %8 = vector.load %arg7[%c0_15, %c0_16] : memref<32x1xf32, #tpu.memory_space<vmem>>, vector<32x1xf32>
    %c0_17 = arith.constant 0 : index
    %c0_18 = arith.constant 0 : index
    %9 = vector.load %arg15[%c0_17, %c0_18] : memref<4x256xf32, #tpu.memory_space<vmem>>, vector<4x256xf32>
    tpu.vector_store %arg15[%c0_17, %c0_18], %1 {strides = array<i32>} : memref<4x256xf32, #tpu.memory_space<vmem>>, vector<4x256xf32>,
    %cst = arith.constant 7.500000e+00 : f32
    %c0_i32 = arith.constant 0 : i32
    %c0_19 = arith.constant 0 : index
    %c0_20 = arith.constant 0 : index
    %10 = vector.load %arg15[%c0_19, %c0_20] : memref<4x256xf32, #tpu.memory_space<vmem>>, vector<4x256xf32>
    %11 = arith.index_cast %c0_i32 : i32 to index
    %12 = memref.load %arg1[%11] : memref<9xf32, #tpu.memory_space<smem>>
    %13 = arith.index_cast %c0_i32 : i32 to index
    %14 = memref.load %arg2[%13] : memref<9xf32, #tpu.memory_space<smem>>
    %c1_i32 = arith.constant 1 : i32
    %15 = arith.addi %c0_i32, %c1_i32 : i32
    %16 = arith.index_cast %15 : i32 to index
    %17 = memref.load %arg1[%16] : memref<9xf32, #tpu.memory_space<smem>>
    %c1_i32_21 = arith.constant 1 : i32
    %18 = arith.addi %c0_i32, %c1_i32_21 : i32
    %19 = arith.index_cast %18 : i32 to index
    %20 = memref.load %arg2[%19] : memref<9xf32, #tpu.memory_space<smem>>
    %cst_22 = arith.constant dense<0.000000e+00> : vector<32x256xf32>
    %21 = tpu.matmul %3, %10, %cst_22 {dimension_numbers = #tpu.dot_dimension_numbers<[1], [0], [0], [1], [0, 0, 1, 1], [], []>} : vector<32x4xf32>, vector<4x256xf32>, vector<32x256xf32> -> vector<32x256xf32>
    %22 = vector.broadcast %4 : vector<32x1xf32> to vector<32x256xf32>
    %23 = arith.addf %21, %22 : vector<32x256xf32>
    %24 = vector.broadcast %7 : vector<32x1xf32> to vector<32x256xf32>
    %25 = arith.addf %23, %24 : vector<32x256xf32>
    %26 = math.tanh %25 : vector<32x256xf32>
    %27 = vector.broadcast %8 : vector<32x1xf32> to vector<32x256xf32>
    %28 = arith.addf %23, %27 : vector<32x256xf32>
    %29 = math.tanh %28 : vector<32x256xf32>
    %30 = arith.subf %26, %29 : vector<32x256xf32>
    %31 = vector.broadcast %cst : f32 to vector<32x256xf32>
    %32 = arith.mulf %31, %30 : vector<32x256xf32>
    %33 = arith.addf %29, %32 : vector<32x256xf32>
    %cst_23 = arith.constant dense<0.000000e+00> : vector<4x256xf32>
    %34 = tpu.matmul %5, %33, %cst_23 {dimension_numbers = #tpu.dot_dimension_numbers<[1], [0], [0], [1], [0, 0, 1, 1], [], []>} : vector<4x32xf32>, vector<32x256xf32>, vector<4x256xf32> -> vector<4x256xf32>
    %35 = vector.broadcast %6 : vector<4x1xf32> to vector<4x256xf32>
    %36 = arith.addf %34, %35 : vector<4x256xf32>
    %37 = vector.broadcast %14 : f32 to vector<4x256xf32>
    %38 = arith.mulf %37, %36 : vector<4x256xf32>
    %39 = arith.subf %10, %38 : vector<4x256xf32>
    %40 = vector.broadcast %12 : f32 to vector<4x256xf32>
    %41 = arith.divf %39, %40 : vector<4x256xf32>
    %cst_24 = arith.constant -1.000000e+00 : f32
    %cst_25 = arith.constant 1.000000e+00 : f32
    %42 = vector.broadcast %cst_24 : f32 to vector<4x256xf32>
    %43 = arith.maximumf %42, %41 : vector<4x256xf32>
    %44 = vector.broadcast %cst_25 : f32 to vector<4x256xf32>
    %45 = arith.minimumf %44, %43 : vector<4x256xf32>
    %46 = vector.broadcast %17 : f32 to vector<4x256xf32>
    %47 = arith.mulf %46, %45 : vector<4x256xf32>
    %48 = vector.broadcast %20 : f32 to vector<4x256xf32>
    %49 = arith.mulf %48, %36 : vector<4x256xf32>
    %50 = arith.addf %47, %49 : vector<4x256xf32>
    %51 = vector.broadcast %17 : f32 to vector<4x256xf32>
    %52 = arith.mulf %51, %0 : vector<4x256xf32>
    %53 = vector.broadcast %20 : f32 to vector<4x256xf32>
    %54 = arith.mulf %53, %1 : vector<4x256xf32>
    %55 = arith.addf %52, %54 : vector<4x256xf32>
    %56 = vector.broadcast %2 : vector<1x256xf32> to vector<4x256xf32>
    %57 = arith.mulf %56, %50 : vector<4x256xf32>
    %cst_26 = arith.constant 1.000000e+00 : f32
    %58 = vector.broadcast %cst_26 : f32 to vector<1x256xf32>
    %59 = arith.subf %58, %2 : vector<1x256xf32>
    %60 = vector.broadcast %59 : vector<1x256xf32> to vector<4x256xf32>
    %61 = arith.mulf %60, %55 : vector<4x256xf32>
    %62 = arith.addf %57, %61 : vector<4x256xf32>
    %c0_27 = arith.constant 0 : index
    %c0_28 = arith.constant 0 : index
    %63 = vector.load %arg15[%c0_27, %c0_28] : memref<4x256xf32, #tpu.memory_space<vmem>>, vector<4x256xf32>
    tpu.vector_store %arg15[%c0_27, %c0_28], %62 {strides = array<i32>} : memref<4x256xf32, #tpu.memory_space<vmem>>, vector<4x256xf32>,
    %c1_i32_29 = arith.constant 1 : i32
    %c0_30 = arith.constant 0 : index
    %c0_31 = arith.constant 0 : index
    %64 = vector.load %arg15[%c0_30, %c0_31] : memref<4x256xf32, #tpu.memory_space<vmem>>, vector<4x256xf32>
    %65 = arith.index_cast %c1_i32_29 : i32 to index
    %66 = memref.load %arg1[%65] : memref<9xf32, #tpu.memory_space<smem>>
    %67 = arith.index_cast %c1_i32_29 : i32 to index
    %68 = memref.load %arg2[%67] : memref<9xf32, #tpu.memory_space<smem>>
    %c1_i32_32 = arith.constant 1 : i32
    %69 = arith.addi %c1_i32_29, %c1_i32_32 : i32
    %70 = arith.index_cast %69 : i32 to index
    %71 = memref.load %arg1[%70] : memref<9xf32, #tpu.memory_space<smem>>
    %c1_i32_33 = arith.constant 1 : i32
    %72 = arith.addi %c1_i32_29, %c1_i32_33 : i32
    %73 = arith.index_cast %72 : i32 to index
    %74 = memref.load %arg2[%73] : memref<9xf32, #tpu.memory_space<smem>>
    %cst_34 = arith.constant dense<0.000000e+00> : vector<32x256xf32>
    %75 = tpu.matmul %3, %64, %cst_34 {dimension_numbers = #tpu.dot_dimension_numbers<[1], [0], [0], [1], [0, 0, 1, 1], [], []>} : vector<32x4xf32>, vector<4x256xf32>, vector<32x256xf32> -> vector<32x256xf32>
    %76 = vector.broadcast %4 : vector<32x1xf32> to vector<32x256xf32>
    %77 = arith.addf %75, %76 : vector<32x256xf32>
    %78 = vector.broadcast %7 : vector<32x1xf32> to vector<32x256xf32>
    %79 = arith.addf %77, %78 : vector<32x256xf32>
    %80 = math.tanh %79 : vector<32x256xf32>
    %81 = vector.broadcast %8 : vector<32x1xf32> to vector<32x256xf32>
    %82 = arith.addf %77, %81 : vector<32x256xf32>
    %83 = math.tanh %82 : vector<32x256xf32>
    %84 = arith.subf %80, %83 : vector<32x256xf32>
    %85 = vector.broadcast %cst : f32 to vector<32x256xf32>
    %86 = arith.mulf %85, %84 : vector<32x256xf32>
    %87 = arith.addf %83, %86 : vector<32x256xf32>
    %cst_35 = arith.constant dense<0.000000e+00> : vector<4x256xf32>
    %88 = tpu.matmul %5, %87, %cst_35 {dimension_numbers = #tpu.dot_dimension_numbers<[1], [0], [0], [1], [0, 0, 1, 1], [], []>} : vector<4x32xf32>, vector<32x256xf32>, vector<4x256xf32> -> vector<4x256xf32>
    %89 = vector.broadcast %6 : vector<4x1xf32> to vector<4x256xf32>
    %90 = arith.addf %88, %89 : vector<4x256xf32>
    %91 = vector.broadcast %68 : f32 to vector<4x256xf32>
    %92 = arith.mulf %91, %90 : vector<4x256xf32>
    %93 = arith.subf %64, %92 : vector<4x256xf32>
    %94 = vector.broadcast %66 : f32 to vector<4x256xf32>
    %95 = arith.divf %93, %94 : vector<4x256xf32>
    %cst_36 = arith.constant -1.000000e+00 : f32
    %cst_37 = arith.constant 1.000000e+00 : f32
    %96 = vector.broadcast %cst_36 : f32 to vector<4x256xf32>
    %97 = arith.maximumf %96, %95 : vector<4x256xf32>
    %98 = vector.broadcast %cst_37 : f32 to vector<4x256xf32>
    %99 = arith.minimumf %98, %97 : vector<4x256xf32>
    %100 = vector.broadcast %71 : f32 to vector<4x256xf32>
    %101 = arith.mulf %100, %99 : vector<4x256xf32>
    %102 = vector.broadcast %74 : f32 to vector<4x256xf32>
    %103 = arith.mulf %102, %90 : vector<4x256xf32>
    %104 = arith.addf %101, %103 : vector<4x256xf32>
    %105 = vector.broadcast %71 : f32 to vector<4x256xf32>
    %106 = arith.mulf %105, %0 : vector<4x256xf32>
    %107 = vector.broadcast %74 : f32 to vector<4x256xf32>
    %108 = arith.mulf %107, %1 : vector<4x256xf32>
    %109 = arith.addf %106, %108 : vector<4x256xf32>
    %110 = vector.broadcast %2 : vector<1x256xf32> to vector<4x256xf32>
    %111 = arith.mulf %110, %104 : vector<4x256xf32>
    %cst_38 = arith.constant 1.000000e+00 : f32
    %112 = vector.broadcast %cst_38 : f32 to vector<1x256xf32>
    %113 = arith.subf %112, %2 : vector<1x256xf32>
    %114 = vector.broadcast %113 : vector<1x256xf32> to vector<4x256xf32>
    %115 = arith.mulf %114, %109 : vector<4x256xf32>
    %116 = arith.addf %111, %115 : vector<4x256xf32>
    %c0_39 = arith.constant 0 : index
    %c0_40 = arith.constant 0 : index
    %117 = vector.load %arg15[%c0_39, %c0_40] : memref<4x256xf32, #tpu.memory_space<vmem>>, vector<4x256xf32>
    tpu.vector_store %arg15[%c0_39, %c0_40], %116 {strides = array<i32>} : memref<4x256xf32, #tpu.memory_space<vmem>>, vector<4x256xf32>,
    %c2_i32 = arith.constant 2 : i32
    %c0_41 = arith.constant 0 : index
    %c0_42 = arith.constant 0 : index
    %118 = vector.load %arg15[%c0_41, %c0_42] : memref<4x256xf32, #tpu.memory_space<vmem>>, vector<4x256xf32>
    %119 = arith.index_cast %c2_i32 : i32 to index
    %120 = memref.load %arg1[%119] : memref<9xf32, #tpu.memory_space<smem>>
    %121 = arith.index_cast %c2_i32 : i32 to index
    %122 = memref.load %arg2[%121] : memref<9xf32, #tpu.memory_space<smem>>
    %c1_i32_43 = arith.constant 1 : i32
    %123 = arith.addi %c2_i32, %c1_i32_43 : i32
    %124 = arith.index_cast %123 : i32 to index
    %125 = memref.load %arg1[%124] : memref<9xf32, #tpu.memory_space<smem>>
    %c1_i32_44 = arith.constant 1 : i32
    %126 = arith.addi %c2_i32, %c1_i32_44 : i32
    %127 = arith.index_cast %126 : i32 to index
    %128 = memref.load %arg2[%127] : memref<9xf32, #tpu.memory_space<smem>>
    %cst_45 = arith.constant dense<0.000000e+00> : vector<32x256xf32>
    %129 = tpu.matmul %3, %118, %cst_45 {dimension_numbers = #tpu.dot_dimension_numbers<[1], [0], [0], [1], [0, 0, 1, 1], [], []>} : vector<32x4xf32>, vector<4x256xf32>, vector<32x256xf32> -> vector<32x256xf32>
    %130 = vector.broadcast %4 : vector<32x1xf32> to vector<32x256xf32>
    %131 = arith.addf %129, %130 : vector<32x256xf32>
    %132 = vector.broadcast %7 : vector<32x1xf32> to vector<32x256xf32>
    %133 = arith.addf %131, %132 : vector<32x256xf32>
    %134 = math.tanh %133 : vector<32x256xf32>
    %135 = vector.broadcast %8 : vector<32x1xf32> to vector<32x256xf32>
    %136 = arith.addf %131, %135 : vector<32x256xf32>
    %137 = math.tanh %136 : vector<32x256xf32>
    %138 = arith.subf %134, %137 : vector<32x256xf32>
    %139 = vector.broadcast %cst : f32 to vector<32x256xf32>
    %140 = arith.mulf %139, %138 : vector<32x256xf32>
    %141 = arith.addf %137, %140 : vector<32x256xf32>
    %cst_46 = arith.constant dense<0.000000e+00> : vector<4x256xf32>
    %142 = tpu.matmul %5, %141, %cst_46 {dimension_numbers = #tpu.dot_dimension_numbers<[1], [0], [0], [1], [0, 0, 1, 1], [], []>} : vector<4x32xf32>, vector<32x256xf32>, vector<4x256xf32> -> vector<4x256xf32>
    %143 = vector.broadcast %6 : vector<4x1xf32> to vector<4x256xf32>
    %144 = arith.addf %142, %143 : vector<4x256xf32>
    %145 = vector.broadcast %122 : f32 to vector<4x256xf32>
    %146 = arith.mulf %145, %144 : vector<4x256xf32>
    %147 = arith.subf %118, %146 : vector<4x256xf32>
    %148 = vector.broadcast %120 : f32 to vector<4x256xf32>
    %149 = arith.divf %147, %148 : vector<4x256xf32>
    %cst_47 = arith.constant -1.000000e+00 : f32
    %cst_48 = arith.constant 1.000000e+00 : f32
    %150 = vector.broadcast %cst_47 : f32 to vector<4x256xf32>
    %151 = arith.maximumf %150, %149 : vector<4x256xf32>
    %152 = vector.broadcast %cst_48 : f32 to vector<4x256xf32>
    %153 = arith.minimumf %152, %151 : vector<4x256xf32>
    %154 = vector.broadcast %125 : f32 to vector<4x256xf32>
    %155 = arith.mulf %154, %153 : vector<4x256xf32>
    %156 = vector.broadcast %128 : f32 to vector<4x256xf32>
    %157 = arith.mulf %156, %144 : vector<4x256xf32>
    %158 = arith.addf %155, %157 : vector<4x256xf32>
    %159 = vector.broadcast %125 : f32 to vector<4x256xf32>
    %160 = arith.mulf %159, %0 : vector<4x256xf32>
    %161 = vector.broadcast %128 : f32 to vector<4x256xf32>
    %162 = arith.mulf %161, %1 : vector<4x256xf32>
    %163 = arith.addf %160, %162 : vector<4x256xf32>
    %164 = vector.broadcast %2 : vector<1x256xf32> to vector<4x256xf32>
    %165 = arith.mulf %164, %158 : vector<4x256xf32>
    %cst_49 = arith.constant 1.000000e+00 : f32
    %166 = vector.broadcast %cst_49 : f32 to vector<1x256xf32>
    %167 = arith.subf %166, %2 : vector<1x256xf32>
    %168 = vector.broadcast %167 : vector<1x256xf32> to vector<4x256xf32>
    %169 = arith.mulf %168, %163 : vector<4x256xf32>
    %170 = arith.addf %165, %169 : vector<4x256xf32>
    %c0_50 = arith.constant 0 : index
    %c0_51 = arith.constant 0 : index
    %171 = vector.load %arg15[%c0_50, %c0_51] : memref<4x256xf32, #tpu.memory_space<vmem>>, vector<4x256xf32>
    tpu.vector_store %arg15[%c0_50, %c0_51], %170 {strides = array<i32>} : memref<4x256xf32, #tpu.memory_space<vmem>>, vector<4x256xf32>,
    %c3_i32 = arith.constant 3 : i32
    %c0_52 = arith.constant 0 : index
    %c0_53 = arith.constant 0 : index
    %172 = vector.load %arg15[%c0_52, %c0_53] : memref<4x256xf32, #tpu.memory_space<vmem>>, vector<4x256xf32>
    %173 = arith.index_cast %c3_i32 : i32 to index
    %174 = memref.load %arg1[%173] : memref<9xf32, #tpu.memory_space<smem>>
    %175 = arith.index_cast %c3_i32 : i32 to index
    %176 = memref.load %arg2[%175] : memref<9xf32, #tpu.memory_space<smem>>
    %c1_i32_54 = arith.constant 1 : i32
    %177 = arith.addi %c3_i32, %c1_i32_54 : i32
    %178 = arith.index_cast %177 : i32 to index
    %179 = memref.load %arg1[%178] : memref<9xf32, #tpu.memory_space<smem>>
    %c1_i32_55 = arith.constant 1 : i32
    %180 = arith.addi %c3_i32, %c1_i32_55 : i32
    %181 = arith.index_cast %180 : i32 to index
    %182 = memref.load %arg2[%181] : memref<9xf32, #tpu.memory_space<smem>>
    %cst_56 = arith.constant dense<0.000000e+00> : vector<32x256xf32>
    %183 = tpu.matmul %3, %172, %cst_56 {dimension_numbers = #tpu.dot_dimension_numbers<[1], [0], [0], [1], [0, 0, 1, 1], [], []>} : vector<32x4xf32>, vector<4x256xf32>, vector<32x256xf32> -> vector<32x256xf32>
    %184 = vector.broadcast %4 : vector<32x1xf32> to vector<32x256xf32>
    %185 = arith.addf %183, %184 : vector<32x256xf32>
    %186 = vector.broadcast %7 : vector<32x1xf32> to vector<32x256xf32>
    %187 = arith.addf %185, %186 : vector<32x256xf32>
    %188 = math.tanh %187 : vector<32x256xf32>
    %189 = vector.broadcast %8 : vector<32x1xf32> to vector<32x256xf32>
    %190 = arith.addf %185, %189 : vector<32x256xf32>
    %191 = math.tanh %190 : vector<32x256xf32>
    %192 = arith.subf %188, %191 : vector<32x256xf32>
    %193 = vector.broadcast %cst : f32 to vector<32x256xf32>
    %194 = arith.mulf %193, %192 : vector<32x256xf32>
    %195 = arith.addf %191, %194 : vector<32x256xf32>
    %cst_57 = arith.constant dense<0.000000e+00> : vector<4x256xf32>
    %196 = tpu.matmul %5, %195, %cst_57 {dimension_numbers = #tpu.dot_dimension_numbers<[1], [0], [0], [1], [0, 0, 1, 1], [], []>} : vector<4x32xf32>, vector<32x256xf32>, vector<4x256xf32> -> vector<4x256xf32>
    %197 = vector.broadcast %6 : vector<4x1xf32> to vector<4x256xf32>
    %198 = arith.addf %196, %197 : vector<4x256xf32>
    %199 = vector.broadcast %176 : f32 to vector<4x256xf32>
    %200 = arith.mulf %199, %198 : vector<4x256xf32>
    %201 = arith.subf %172, %200 : vector<4x256xf32>
    %202 = vector.broadcast %174 : f32 to vector<4x256xf32>
    %203 = arith.divf %201, %202 : vector<4x256xf32>
    %cst_58 = arith.constant -1.000000e+00 : f32
    %cst_59 = arith.constant 1.000000e+00 : f32
    %204 = vector.broadcast %cst_58 : f32 to vector<4x256xf32>
    %205 = arith.maximumf %204, %203 : vector<4x256xf32>
    %206 = vector.broadcast %cst_59 : f32 to vector<4x256xf32>
    %207 = arith.minimumf %206, %205 : vector<4x256xf32>
    %208 = vector.broadcast %179 : f32 to vector<4x256xf32>
    %209 = arith.mulf %208, %207 : vector<4x256xf32>
    %210 = vector.broadcast %182 : f32 to vector<4x256xf32>
    %211 = arith.mulf %210, %198 : vector<4x256xf32>
    %212 = arith.addf %209, %211 : vector<4x256xf32>
    %213 = vector.broadcast %179 : f32 to vector<4x256xf32>
    %214 = arith.mulf %213, %0 : vector<4x256xf32>
    %215 = vector.broadcast %182 : f32 to vector<4x256xf32>
    %216 = arith.mulf %215, %1 : vector<4x256xf32>
    %217 = arith.addf %214, %216 : vector<4x256xf32>
    %218 = vector.broadcast %2 : vector<1x256xf32> to vector<4x256xf32>
    %219 = arith.mulf %218, %212 : vector<4x256xf32>
    %cst_60 = arith.constant 1.000000e+00 : f32
    %220 = vector.broadcast %cst_60 : f32 to vector<1x256xf32>
    %221 = arith.subf %220, %2 : vector<1x256xf32>
    %222 = vector.broadcast %221 : vector<1x256xf32> to vector<4x256xf32>
    %223 = arith.mulf %222, %217 : vector<4x256xf32>
    %224 = arith.addf %219, %223 : vector<4x256xf32>
    %c0_61 = arith.constant 0 : index
    %c0_62 = arith.constant 0 : index
    %225 = vector.load %arg15[%c0_61, %c0_62] : memref<4x256xf32, #tpu.memory_space<vmem>>, vector<4x256xf32>
    tpu.vector_store %arg15[%c0_61, %c0_62], %224 {strides = array<i32>} : memref<4x256xf32, #tpu.memory_space<vmem>>, vector<4x256xf32>,
    %c4_i32 = arith.constant 4 : i32
    %c0_63 = arith.constant 0 : index
    %c0_64 = arith.constant 0 : index
    %226 = vector.load %arg15[%c0_63, %c0_64] : memref<4x256xf32, #tpu.memory_space<vmem>>, vector<4x256xf32>
    %227 = arith.index_cast %c4_i32 : i32 to index
    %228 = memref.load %arg1[%227] : memref<9xf32, #tpu.memory_space<smem>>
    %229 = arith.index_cast %c4_i32 : i32 to index
    %230 = memref.load %arg2[%229] : memref<9xf32, #tpu.memory_space<smem>>
    %c1_i32_65 = arith.constant 1 : i32
    %231 = arith.addi %c4_i32, %c1_i32_65 : i32
    %232 = arith.index_cast %231 : i32 to index
    %233 = memref.load %arg1[%232] : memref<9xf32, #tpu.memory_space<smem>>
    %c1_i32_66 = arith.constant 1 : i32
    %234 = arith.addi %c4_i32, %c1_i32_66 : i32
    %235 = arith.index_cast %234 : i32 to index
    %236 = memref.load %arg2[%235] : memref<9xf32, #tpu.memory_space<smem>>
    %cst_67 = arith.constant dense<0.000000e+00> : vector<32x256xf32>
    %237 = tpu.matmul %3, %226, %cst_67 {dimension_numbers = #tpu.dot_dimension_numbers<[1], [0], [0], [1], [0, 0, 1, 1], [], []>} : vector<32x4xf32>, vector<4x256xf32>, vector<32x256xf32> -> vector<32x256xf32>
    %238 = vector.broadcast %4 : vector<32x1xf32> to vector<32x256xf32>
    %239 = arith.addf %237, %238 : vector<32x256xf32>
    %240 = vector.broadcast %7 : vector<32x1xf32> to vector<32x256xf32>
    %241 = arith.addf %239, %240 : vector<32x256xf32>
    %242 = math.tanh %241 : vector<32x256xf32>
    %243 = vector.broadcast %8 : vector<32x1xf32> to vector<32x256xf32>
    %244 = arith.addf %239, %243 : vector<32x256xf32>
    %245 = math.tanh %244 : vector<32x256xf32>
    %246 = arith.subf %242, %245 : vector<32x256xf32>
    %247 = vector.broadcast %cst : f32 to vector<32x256xf32>
    %248 = arith.mulf %247, %246 : vector<32x256xf32>
    %249 = arith.addf %245, %248 : vector<32x256xf32>
    %cst_68 = arith.constant dense<0.000000e+00> : vector<4x256xf32>
    %250 = tpu.matmul %5, %249, %cst_68 {dimension_numbers = #tpu.dot_dimension_numbers<[1], [0], [0], [1], [0, 0, 1, 1], [], []>} : vector<4x32xf32>, vector<32x256xf32>, vector<4x256xf32> -> vector<4x256xf32>
    %251 = vector.broadcast %6 : vector<4x1xf32> to vector<4x256xf32>
    %252 = arith.addf %250, %251 : vector<4x256xf32>
    %253 = vector.broadcast %230 : f32 to vector<4x256xf32>
    %254 = arith.mulf %253, %252 : vector<4x256xf32>
    %255 = arith.subf %226, %254 : vector<4x256xf32>
    %256 = vector.broadcast %228 : f32 to vector<4x256xf32>
    %257 = arith.divf %255, %256 : vector<4x256xf32>
    %cst_69 = arith.constant -1.000000e+00 : f32
    %cst_70 = arith.constant 1.000000e+00 : f32
    %258 = vector.broadcast %cst_69 : f32 to vector<4x256xf32>
    %259 = arith.maximumf %258, %257 : vector<4x256xf32>
    %260 = vector.broadcast %cst_70 : f32 to vector<4x256xf32>
    %261 = arith.minimumf %260, %259 : vector<4x256xf32>
    %262 = vector.broadcast %233 : f32 to vector<4x256xf32>
    %263 = arith.mulf %262, %261 : vector<4x256xf32>
    %264 = vector.broadcast %236 : f32 to vector<4x256xf32>
    %265 = arith.mulf %264, %252 : vector<4x256xf32>
    %266 = arith.addf %263, %265 : vector<4x256xf32>
    %267 = vector.broadcast %233 : f32 to vector<4x256xf32>
    %268 = arith.mulf %267, %0 : vector<4x256xf32>
    %269 = vector.broadcast %236 : f32 to vector<4x256xf32>
    %270 = arith.mulf %269, %1 : vector<4x256xf32>
    %271 = arith.addf %268, %270 : vector<4x256xf32>
    %272 = vector.broadcast %2 : vector<1x256xf32> to vector<4x256xf32>
    %273 = arith.mulf %272, %266 : vector<4x256xf32>
    %cst_71 = arith.constant 1.000000e+00 : f32
    %274 = vector.broadcast %cst_71 : f32 to vector<1x256xf32>
    %275 = arith.subf %274, %2 : vector<1x256xf32>
    %276 = vector.broadcast %275 : vector<1x256xf32> to vector<4x256xf32>
    %277 = arith.mulf %276, %271 : vector<4x256xf32>
    %278 = arith.addf %273, %277 : vector<4x256xf32>
    %c0_72 = arith.constant 0 : index
    %c0_73 = arith.constant 0 : index
    %279 = vector.load %arg15[%c0_72, %c0_73] : memref<4x256xf32, #tpu.memory_space<vmem>>, vector<4x256xf32>
    tpu.vector_store %arg15[%c0_72, %c0_73], %278 {strides = array<i32>} : memref<4x256xf32, #tpu.memory_space<vmem>>, vector<4x256xf32>,
    %c5_i32 = arith.constant 5 : i32
    %c0_74 = arith.constant 0 : index
    %c0_75 = arith.constant 0 : index
    %280 = vector.load %arg15[%c0_74, %c0_75] : memref<4x256xf32, #tpu.memory_space<vmem>>, vector<4x256xf32>
    %281 = arith.index_cast %c5_i32 : i32 to index
    %282 = memref.load %arg1[%281] : memref<9xf32, #tpu.memory_space<smem>>
    %283 = arith.index_cast %c5_i32 : i32 to index
    %284 = memref.load %arg2[%283] : memref<9xf32, #tpu.memory_space<smem>>
    %c1_i32_76 = arith.constant 1 : i32
    %285 = arith.addi %c5_i32, %c1_i32_76 : i32
    %286 = arith.index_cast %285 : i32 to index
    %287 = memref.load %arg1[%286] : memref<9xf32, #tpu.memory_space<smem>>
    %c1_i32_77 = arith.constant 1 : i32
    %288 = arith.addi %c5_i32, %c1_i32_77 : i32
    %289 = arith.index_cast %288 : i32 to index
    %290 = memref.load %arg2[%289] : memref<9xf32, #tpu.memory_space<smem>>
    %cst_78 = arith.constant dense<0.000000e+00> : vector<32x256xf32>
    %291 = tpu.matmul %3, %280, %cst_78 {dimension_numbers = #tpu.dot_dimension_numbers<[1], [0], [0], [1], [0, 0, 1, 1], [], []>} : vector<32x4xf32>, vector<4x256xf32>, vector<32x256xf32> -> vector<32x256xf32>
    %292 = vector.broadcast %4 : vector<32x1xf32> to vector<32x256xf32>
    %293 = arith.addf %291, %292 : vector<32x256xf32>
    %294 = vector.broadcast %7 : vector<32x1xf32> to vector<32x256xf32>
    %295 = arith.addf %293, %294 : vector<32x256xf32>
    %296 = math.tanh %295 : vector<32x256xf32>
    %297 = vector.broadcast %8 : vector<32x1xf32> to vector<32x256xf32>
    %298 = arith.addf %293, %297 : vector<32x256xf32>
    %299 = math.tanh %298 : vector<32x256xf32>
    %300 = arith.subf %296, %299 : vector<32x256xf32>
    %301 = vector.broadcast %cst : f32 to vector<32x256xf32>
    %302 = arith.mulf %301, %300 : vector<32x256xf32>
    %303 = arith.addf %299, %302 : vector<32x256xf32>
    %cst_79 = arith.constant dense<0.000000e+00> : vector<4x256xf32>
    %304 = tpu.matmul %5, %303, %cst_79 {dimension_numbers = #tpu.dot_dimension_numbers<[1], [0], [0], [1], [0, 0, 1, 1], [], []>} : vector<4x32xf32>, vector<32x256xf32>, vector<4x256xf32> -> vector<4x256xf32>
    %305 = vector.broadcast %6 : vector<4x1xf32> to vector<4x256xf32>
    %306 = arith.addf %304, %305 : vector<4x256xf32>
    %307 = vector.broadcast %284 : f32 to vector<4x256xf32>
    %308 = arith.mulf %307, %306 : vector<4x256xf32>
    %309 = arith.subf %280, %308 : vector<4x256xf32>
    %310 = vector.broadcast %282 : f32 to vector<4x256xf32>
    %311 = arith.divf %309, %310 : vector<4x256xf32>
    %cst_80 = arith.constant -1.000000e+00 : f32
    %cst_81 = arith.constant 1.000000e+00 : f32
    %312 = vector.broadcast %cst_80 : f32 to vector<4x256xf32>
    %313 = arith.maximumf %312, %311 : vector<4x256xf32>
    %314 = vector.broadcast %cst_81 : f32 to vector<4x256xf32>
    %315 = arith.minimumf %314, %313 : vector<4x256xf32>
    %316 = vector.broadcast %287 : f32 to vector<4x256xf32>
    %317 = arith.mulf %316, %315 : vector<4x256xf32>
    %318 = vector.broadcast %290 : f32 to vector<4x256xf32>
    %319 = arith.mulf %318, %306 : vector<4x256xf32>
    %320 = arith.addf %317, %319 : vector<4x256xf32>
    %321 = vector.broadcast %287 : f32 to vector<4x256xf32>
    %322 = arith.mulf %321, %0 : vector<4x256xf32>
    %323 = vector.broadcast %290 : f32 to vector<4x256xf32>
    %324 = arith.mulf %323, %1 : vector<4x256xf32>
    %325 = arith.addf %322, %324 : vector<4x256xf32>
    %326 = vector.broadcast %2 : vector<1x256xf32> to vector<4x256xf32>
    %327 = arith.mulf %326, %320 : vector<4x256xf32>
    %cst_82 = arith.constant 1.000000e+00 : f32
    %328 = vector.broadcast %cst_82 : f32 to vector<1x256xf32>
    %329 = arith.subf %328, %2 : vector<1x256xf32>
    %330 = vector.broadcast %329 : vector<1x256xf32> to vector<4x256xf32>
    %331 = arith.mulf %330, %325 : vector<4x256xf32>
    %332 = arith.addf %327, %331 : vector<4x256xf32>
    %c0_83 = arith.constant 0 : index
    %c0_84 = arith.constant 0 : index
    %333 = vector.load %arg15[%c0_83, %c0_84] : memref<4x256xf32, #tpu.memory_space<vmem>>, vector<4x256xf32>
    tpu.vector_store %arg15[%c0_83, %c0_84], %332 {strides = array<i32>} : memref<4x256xf32, #tpu.memory_space<vmem>>, vector<4x256xf32>,
    %c6_i32 = arith.constant 6 : i32
    %c0_85 = arith.constant 0 : index
    %c0_86 = arith.constant 0 : index
    %334 = vector.load %arg15[%c0_85, %c0_86] : memref<4x256xf32, #tpu.memory_space<vmem>>, vector<4x256xf32>
    %335 = arith.index_cast %c6_i32 : i32 to index
    %336 = memref.load %arg1[%335] : memref<9xf32, #tpu.memory_space<smem>>
    %337 = arith.index_cast %c6_i32 : i32 to index
    %338 = memref.load %arg2[%337] : memref<9xf32, #tpu.memory_space<smem>>
    %c1_i32_87 = arith.constant 1 : i32
    %339 = arith.addi %c6_i32, %c1_i32_87 : i32
    %340 = arith.index_cast %339 : i32 to index
    %341 = memref.load %arg1[%340] : memref<9xf32, #tpu.memory_space<smem>>
    %c1_i32_88 = arith.constant 1 : i32
    %342 = arith.addi %c6_i32, %c1_i32_88 : i32
    %343 = arith.index_cast %342 : i32 to index
    %344 = memref.load %arg2[%343] : memref<9xf32, #tpu.memory_space<smem>>
    %cst_89 = arith.constant dense<0.000000e+00> : vector<32x256xf32>
    %345 = tpu.matmul %3, %334, %cst_89 {dimension_numbers = #tpu.dot_dimension_numbers<[1], [0], [0], [1], [0, 0, 1, 1], [], []>} : vector<32x4xf32>, vector<4x256xf32>, vector<32x256xf32> -> vector<32x256xf32>
    %346 = vector.broadcast %4 : vector<32x1xf32> to vector<32x256xf32>
    %347 = arith.addf %345, %346 : vector<32x256xf32>
    %348 = vector.broadcast %7 : vector<32x1xf32> to vector<32x256xf32>
    %349 = arith.addf %347, %348 : vector<32x256xf32>
    %350 = math.tanh %349 : vector<32x256xf32>
    %351 = vector.broadcast %8 : vector<32x1xf32> to vector<32x256xf32>
    %352 = arith.addf %347, %351 : vector<32x256xf32>
    %353 = math.tanh %352 : vector<32x256xf32>
    %354 = arith.subf %350, %353 : vector<32x256xf32>
    %355 = vector.broadcast %cst : f32 to vector<32x256xf32>
    %356 = arith.mulf %355, %354 : vector<32x256xf32>
    %357 = arith.addf %353, %356 : vector<32x256xf32>
    %cst_90 = arith.constant dense<0.000000e+00> : vector<4x256xf32>
    %358 = tpu.matmul %5, %357, %cst_90 {dimension_numbers = #tpu.dot_dimension_numbers<[1], [0], [0], [1], [0, 0, 1, 1], [], []>} : vector<4x32xf32>, vector<32x256xf32>, vector<4x256xf32> -> vector<4x256xf32>
    %359 = vector.broadcast %6 : vector<4x1xf32> to vector<4x256xf32>
    %360 = arith.addf %358, %359 : vector<4x256xf32>
    %361 = vector.broadcast %338 : f32 to vector<4x256xf32>
    %362 = arith.mulf %361, %360 : vector<4x256xf32>
    %363 = arith.subf %334, %362 : vector<4x256xf32>
    %364 = vector.broadcast %336 : f32 to vector<4x256xf32>
    %365 = arith.divf %363, %364 : vector<4x256xf32>
    %cst_91 = arith.constant -1.000000e+00 : f32
    %cst_92 = arith.constant 1.000000e+00 : f32
    %366 = vector.broadcast %cst_91 : f32 to vector<4x256xf32>
    %367 = arith.maximumf %366, %365 : vector<4x256xf32>
    %368 = vector.broadcast %cst_92 : f32 to vector<4x256xf32>
    %369 = arith.minimumf %368, %367 : vector<4x256xf32>
    %370 = vector.broadcast %341 : f32 to vector<4x256xf32>
    %371 = arith.mulf %370, %369 : vector<4x256xf32>
    %372 = vector.broadcast %344 : f32 to vector<4x256xf32>
    %373 = arith.mulf %372, %360 : vector<4x256xf32>
    %374 = arith.addf %371, %373 : vector<4x256xf32>
    %375 = vector.broadcast %341 : f32 to vector<4x256xf32>
    %376 = arith.mulf %375, %0 : vector<4x256xf32>
    %377 = vector.broadcast %344 : f32 to vector<4x256xf32>
    %378 = arith.mulf %377, %1 : vector<4x256xf32>
    %379 = arith.addf %376, %378 : vector<4x256xf32>
    %380 = vector.broadcast %2 : vector<1x256xf32> to vector<4x256xf32>
    %381 = arith.mulf %380, %374 : vector<4x256xf32>
    %cst_93 = arith.constant 1.000000e+00 : f32
    %382 = vector.broadcast %cst_93 : f32 to vector<1x256xf32>
    %383 = arith.subf %382, %2 : vector<1x256xf32>
    %384 = vector.broadcast %383 : vector<1x256xf32> to vector<4x256xf32>
    %385 = arith.mulf %384, %379 : vector<4x256xf32>
    %386 = arith.addf %381, %385 : vector<4x256xf32>
    %c0_94 = arith.constant 0 : index
    %c0_95 = arith.constant 0 : index
    %387 = vector.load %arg15[%c0_94, %c0_95] : memref<4x256xf32, #tpu.memory_space<vmem>>, vector<4x256xf32>
    tpu.vector_store %arg15[%c0_94, %c0_95], %386 {strides = array<i32>} : memref<4x256xf32, #tpu.memory_space<vmem>>, vector<4x256xf32>,
    %c7_i32 = arith.constant 7 : i32
    %c0_96 = arith.constant 0 : index
    %c0_97 = arith.constant 0 : index
    %388 = vector.load %arg15[%c0_96, %c0_97] : memref<4x256xf32, #tpu.memory_space<vmem>>, vector<4x256xf32>
    %389 = arith.index_cast %c7_i32 : i32 to index
    %390 = memref.load %arg1[%389] : memref<9xf32, #tpu.memory_space<smem>>
    %391 = arith.index_cast %c7_i32 : i32 to index
    %392 = memref.load %arg2[%391] : memref<9xf32, #tpu.memory_space<smem>>
    %c1_i32_98 = arith.constant 1 : i32
    %393 = arith.addi %c7_i32, %c1_i32_98 : i32
    %394 = arith.index_cast %393 : i32 to index
    %395 = memref.load %arg1[%394] : memref<9xf32, #tpu.memory_space<smem>>
    %c1_i32_99 = arith.constant 1 : i32
    %396 = arith.addi %c7_i32, %c1_i32_99 : i32
    %397 = arith.index_cast %396 : i32 to index
    %398 = memref.load %arg2[%397] : memref<9xf32, #tpu.memory_space<smem>>
    %cst_100 = arith.constant dense<0.000000e+00> : vector<32x256xf32>
    %399 = tpu.matmul %3, %388, %cst_100 {dimension_numbers = #tpu.dot_dimension_numbers<[1], [0], [0], [1], [0, 0, 1, 1], [], []>} : vector<32x4xf32>, vector<4x256xf32>, vector<32x256xf32> -> vector<32x256xf32>
    %400 = vector.broadcast %4 : vector<32x1xf32> to vector<32x256xf32>
    %401 = arith.addf %399, %400 : vector<32x256xf32>
    %402 = vector.broadcast %7 : vector<32x1xf32> to vector<32x256xf32>
    %403 = arith.addf %401, %402 : vector<32x256xf32>
    %404 = math.tanh %403 : vector<32x256xf32>
    %405 = vector.broadcast %8 : vector<32x1xf32> to vector<32x256xf32>
    %406 = arith.addf %401, %405 : vector<32x256xf32>
    %407 = math.tanh %406 : vector<32x256xf32>
    %408 = arith.subf %404, %407 : vector<32x256xf32>
    %409 = vector.broadcast %cst : f32 to vector<32x256xf32>
    %410 = arith.mulf %409, %408 : vector<32x256xf32>
    %411 = arith.addf %407, %410 : vector<32x256xf32>
    %cst_101 = arith.constant dense<0.000000e+00> : vector<4x256xf32>
    %412 = tpu.matmul %5, %411, %cst_101 {dimension_numbers = #tpu.dot_dimension_numbers<[1], [0], [0], [1], [0, 0, 1, 1], [], []>} : vector<4x32xf32>, vector<32x256xf32>, vector<4x256xf32> -> vector<4x256xf32>
    %413 = vector.broadcast %6 : vector<4x1xf32> to vector<4x256xf32>
    %414 = arith.addf %412, %413 : vector<4x256xf32>
    %415 = vector.broadcast %392 : f32 to vector<4x256xf32>
    %416 = arith.mulf %415, %414 : vector<4x256xf32>
    %417 = arith.subf %388, %416 : vector<4x256xf32>
    %418 = vector.broadcast %390 : f32 to vector<4x256xf32>
    %419 = arith.divf %417, %418 : vector<4x256xf32>
    %cst_102 = arith.constant -1.000000e+00 : f32
    %cst_103 = arith.constant 1.000000e+00 : f32
    %420 = vector.broadcast %cst_102 : f32 to vector<4x256xf32>
    %421 = arith.maximumf %420, %419 : vector<4x256xf32>
    %422 = vector.broadcast %cst_103 : f32 to vector<4x256xf32>
    %423 = arith.minimumf %422, %421 : vector<4x256xf32>
    %424 = vector.broadcast %395 : f32 to vector<4x256xf32>
    %425 = arith.mulf %424, %423 : vector<4x256xf32>
    %426 = vector.broadcast %398 : f32 to vector<4x256xf32>
    %427 = arith.mulf %426, %414 : vector<4x256xf32>
    %428 = arith.addf %425, %427 : vector<4x256xf32>
    %429 = vector.broadcast %395 : f32 to vector<4x256xf32>
    %430 = arith.mulf %429, %0 : vector<4x256xf32>
    %431 = vector.broadcast %398 : f32 to vector<4x256xf32>
    %432 = arith.mulf %431, %1 : vector<4x256xf32>
    %433 = arith.addf %430, %432 : vector<4x256xf32>
    %434 = vector.broadcast %2 : vector<1x256xf32> to vector<4x256xf32>
    %435 = arith.mulf %434, %428 : vector<4x256xf32>
    %cst_104 = arith.constant 1.000000e+00 : f32
    %436 = vector.broadcast %cst_104 : f32 to vector<1x256xf32>
    %437 = arith.subf %436, %2 : vector<1x256xf32>
    %438 = vector.broadcast %437 : vector<1x256xf32> to vector<4x256xf32>
    %439 = arith.mulf %438, %433 : vector<4x256xf32>
    %440 = arith.addf %435, %439 : vector<4x256xf32>
    %c0_105 = arith.constant 0 : index
    %c0_106 = arith.constant 0 : index
    %441 = vector.load %arg15[%c0_105, %c0_106] : memref<4x256xf32, #tpu.memory_space<vmem>>, vector<4x256xf32>
    tpu.vector_store %arg15[%c0_105, %c0_106], %440 {strides = array<i32>} : memref<4x256xf32, #tpu.memory_space<vmem>>, vector<4x256xf32>,
    %c8_i32 = arith.constant 8 : i32
    %c0_107 = arith.constant 0 : index
    %c0_108 = arith.constant 0 : index
    %442 = vector.load %arg12[%c0_107, %c0_108] : memref<3x4xf32, #tpu.memory_space<vmem>>, vector<3x4xf32>
    %c0_109 = arith.constant 0 : index
    %c0_110 = arith.constant 0 : index
    %443 = vector.load %arg15[%c0_109, %c0_110] : memref<4x256xf32, #tpu.memory_space<vmem>>, vector<4x256xf32>
    %cst_111 = arith.constant dense<0.000000e+00> : vector<3x256xf32>
    %444 = tpu.matmul %442, %443, %cst_111 {dimension_numbers = #tpu.dot_dimension_numbers<[1], [0], [0], [1], [0, 0, 1, 1], [], []>} : vector<3x4xf32>, vector<4x256xf32>, vector<3x256xf32> -> vector<3x256xf32>
    %c0_112 = arith.constant 0 : index
    %c0_113 = arith.constant 0 : index
    %445 = vector.load %arg13[%c0_112, %c0_113] : memref<3x1xf32, #tpu.memory_space<vmem>>, vector<3x1xf32>
    %446 = vector.broadcast %445 : vector<3x1xf32> to vector<3x256xf32>
    %447 = arith.addf %444, %446 : vector<3x256xf32>
    %448 = arith.negf %447 : vector<3x256xf32>
    %449 = math.exp %448 : vector<3x256xf32>
    %cst_114 = arith.constant 1.000000e+00 : f32
    %450 = vector.broadcast %cst_114 : f32 to vector<3x256xf32>
    %451 = arith.addf %450, %449 : vector<3x256xf32>
    %452 = arith.divf %450, %451 : vector<3x256xf32>
    %c0_115 = arith.constant 0 : index
    %c0_116 = arith.constant 0 : index
    %453 = vector.load %arg14[%c0_115, %c0_116] : memref<3x256xf32, #tpu.memory_space<vmem>>, vector<3x256xf32>
    tpu.vector_store %arg14[%c0_115, %c0_116], %452 {strides = array<i32>} : memref<3x256xf32, #tpu.memory_space<vmem>>, vector<3x256xf32>,
    return
  }
  func.func @transform_0(%arg0: i32, %arg1: memref<9xf32, #tpu.memory_space<smem>>, %arg2: memref<9xf32, #tpu.memory_space<smem>>) -> (i32, i32) {
    %c0_i32 = arith.constant 0 : i32
    %c0_i32_0 = arith.constant 0 : i32
    %c0_i32_1 = arith.constant 0 : i32
    return %c0_i32, %c0_i32_0 : i32, i32
  }
  func.func @transform_1(%arg0: i32, %arg1: memref<9xf32, #tpu.memory_space<smem>>, %arg2: memref<9xf32, #tpu.memory_space<smem>>) -> (i32, i32) {
    %c0_i32 = arith.constant 0 : i32
    %c0_i32_0 = arith.constant 0 : i32
    %c0_i32_1 = arith.constant 0 : i32
    return %c0_i32, %c0_i32_0 : i32, i32
  }
  func.func @transform_2(%arg0: i32, %arg1: memref<9xf32, #tpu.memory_space<smem>>, %arg2: memref<9xf32, #tpu.memory_space<smem>>) -> (i32, i32) {
    %c0_i32 = arith.constant 0 : i32
    %c0_i32_0 = arith.constant 0 : i32
    %c0_i32_1 = arith.constant 0 : i32
    return %c0_i32, %c0_i32_0 : i32, i32
  }
  func.func @transform_3(%arg0: i32, %arg1: memref<9xf32, #tpu.memory_space<smem>>, %arg2: memref<9xf32, #tpu.memory_space<smem>>) -> (i32, i32) {
    %c0_i32 = arith.constant 0 : i32
    %c0_i32_0 = arith.constant 0 : i32
    %c0_i32_1 = arith.constant 0 : i32
    return %c0_i32, %c0_i32_0 : i32, i32
  }
  func.func @transform_4(%arg0: i32, %arg1: memref<9xf32, #tpu.memory_space<smem>>, %arg2: memref<9xf32, #tpu.memory_space<smem>>) -> (i32, i32) {
    %c0_i32 = arith.constant 0 : i32
    %c0_i32_0 = arith.constant 0 : i32
    %c0_i32_1 = arith.constant 0 : i32
    return %c0_i32, %c0_i32_0 : i32, i32
  }
  func.func @transform_5(%arg0: i32, %arg1: memref<9xf32, #tpu.memory_space<smem>>, %arg2: memref<9xf32, #tpu.memory_space<smem>>) -> (i32, i32) {
    %c0_i32 = arith.constant 0 : i32
    %c0_i32_0 = arith.constant 0 : i32
    %c0_i32_1 = arith.constant 0 : i32
    return %c0_i32, %c0_i32_0 : i32, i32
  }
  func.func @transform_6(%arg0: i32, %arg1: memref<9xf32, #tpu.memory_space<smem>>, %arg2: memref<9xf32, #tpu.memory_space<smem>>) -> (i32, i32) {
    %c0_i32 = arith.constant 0 : i32
    %c0_i32_0 = arith.constant 0 : i32
    %c0_i32_1 = arith.constant 0 : i32
    return %c0_i32, %c0_i32_0 : i32, i32
  }
  func.func @transform_7(%arg0: i32, %arg1: memref<9xf32, #tpu.memory_space<smem>>, %arg2: memref<9xf32, #tpu.memory_space<smem>>) -> (i32, i32) {
    %c0_i32 = arith.constant 0 : i32
    %c0_i32_0 = arith.constant 0 : i32
    %c0_i32_1 = arith.constant 0 : i32
    return %c0_i32, %c0_i32_0 : i32, i32
  }
  func.func @transform_8(%arg0: i32, %arg1: memref<9xf32, #tpu.memory_space<smem>>, %arg2: memref<9xf32, #tpu.memory_space<smem>>) -> (i32, i32) {
    %c0_i32 = arith.constant 0 : i32
    %c0_i32_0 = arith.constant 0 : i32
    %c0_i32_1 = arith.constant 0 : i32
    return %c0_i32, %c0_i32_0 : i32, i32
  }
  func.func @transform_9(%arg0: i32, %arg1: memref<9xf32, #tpu.memory_space<smem>>, %arg2: memref<9xf32, #tpu.memory_space<smem>>) -> (i32, i32) {
    %c0_i32 = arith.constant 0 : i32
    %c0_i32_0 = arith.constant 0 : i32
    %c0_i32_1 = arith.constant 0 : i32
    return %c0_i32, %c0_i32_0 : i32, i32
  }
  func.func @transform_10(%arg0: i32, %arg1: memref<9xf32, #tpu.memory_space<smem>>, %arg2: memref<9xf32, #tpu.memory_space<smem>>) -> (i32, i32) {
    %c0_i32 = arith.constant 0 : i32
    %c0_i32_0 = arith.constant 0 : i32
    %c0_i32_1 = arith.constant 0 : i32
    return %c0_i32, %c0_i32_0 : i32, i32
  }
  func.func @transform_11(%arg0: i32, %arg1: memref<9xf32, #tpu.memory_space<smem>>, %arg2: memref<9xf32, #tpu.memory_space<smem>>) -> (i32, i32) {
    %c0_i32 = arith.constant 0 : i32
    %c0_i32_0 = arith.constant 0 : i32
    %c0_i32_1 = arith.constant 0 : i32
    return %c0_i32, %c0_i32_0 : i32, i32
  }
}

</mosaic_0001>

<bundles_post_ra>
// kernel: tpu_custom_call.1
= control target key start
LH: loop header
LB: loop body
LE: loop exit
PB: predicated region body
PF: predicated region fallthrough
CT: control target
= control target key end

     0   :  { %s3734_s0 = inlined_call_operand.vmem [shape: f32[9], index: 0, kind: input, shape index: {}]   ;;  %s3735_s2 = inlined_call_operand.vmem [shape: f32[4,256], index: 2, kind: input, shape index: {}]   ;;  %s3736_s3 = inlined_call_operand.vmem [shape: f32[4,256], index: 3, kind: input, shape index: {}]   ;;  %s3737_s4 = inlined_call_operand.vmem [shape: f32[1,256], index: 4, kind: input, shape index: {}]   ;;  %s3738_s5 = inlined_call_operand.vmem [shape: f32[32,1], index: 5, kind: input, shape index: {}]   ;;  %s3739_s6 = inlined_call_operand.vmem [shape: f32[32,1], index: 6, kind: input, shape index: {}]   ;;  %s3740_s7 = inlined_call_operand.vmem [shape: f32[32,4], index: 7, kind: input, shape index: {}]   ;;  %s3741_s8 = inlined_call_operand.vmem [shape: f32[32,1], index: 8, kind: input, shape index: {}]   ;;  %s3742_s9 = inlined_call_operand.vmem [shape: f32[4,32], index: 9, kind: input, shape index: {}]   ;;  %s3743_s10 = inlined_call_operand.vmem [shape: f32[4,1], index: 10, kind: input, shape index: {}]   ;;  %s3744_s11 = inlined_call_operand.vmem [shape: f32[3,4], index: 11, kind: input, shape index: {}]   ;;  %s3745_s12 = inlined_call_operand.vmem [shape: f32[3,1], index: 12, kind: input, shape index: {}]   ;;  %s3746_s13 = inlined_call_operand.hbm [shape: f32[3,256], index: 13, kind: output, shape index: {}]   ;;  %s3747_s1 = inlined_call_operand.vmem [shape: f32[9], index: 1, kind: input, shape index: {}]  }
   0x1   :  { %s18_s27 = sshll.u32 %s3734_s0, 4  ;;  %s22_s30 = sshll.u32 %s3747_s1, 4  ;;  %s19_s27 = int_to_ptr.vmem [resolvable:$true] %s18_s27  ;;  %s23_s30 = int_to_ptr.vmem [resolvable:$true] %s22_s30 }
   0x2   :  { %s2925_s14 = scalar_lea.vmem %s19_s27, 16  ;;  %p2930_p1 = scmp.lt.s32.totalorder %s19_s27, %s19_s27 }
   0x3   :  { %p2926_p0 = scmp.ne.s32.totalorder %s19_s27, %s2925_s14  ;;  %p2931_p2 = scmp.lt.s32.totalorder %s2925_s14, %s2925_s14 }
   0x5   :  { %p2932_p3 = por %p2931_p2, %p2930_p1 }
   0x7   :  { %p2933_p4 = pnand %p2932_p3, %p2926_p0 }
   0x9   :  { %2936 = shalt.err (!%p2933_p4)  }
   0xa   :  { %s2975_s15 = smov [#allocation4]   ;;  %s2937_s16 = scalar_lea.vmem %s23_s30, 16 }
   0xb   :  { %21 = dma.vmem_to_smem %s19_s27, 16, %s2975_s15, [#allocation3] }
   0xc   :  { %p2938_p5 = scmp.ne.s32.totalorder %s23_s30, %s2937_s16  ;;  %p2942_p6 = scmp.lt.s32.totalorder %s23_s30, %s23_s30 }
   0xd   :  { %p2943_p7 = scmp.lt.s32.totalorder %s2937_s16, %s2937_s16 }
   0xf   :  { %p2944_p8 = por %p2943_p7, %p2942_p6 }
  0x11   :  { %p2945_p9 = pnand %p2944_p8, %p2938_p5 }
  0x13   :  { %2948 = shalt.err (!%p2945_p9)  }
  0x14   :  { %s2976_s0 = smov [#allocation5]  }
  0x15   :  { %25 = dma.vmem_to_smem %s23_s30, 16, %s2976_s0, [#allocation3] }
  0x16   :  { %2971 = dma.done.wait [#allocation3], 32 }
  0x17   :  { %2972 = vsyncadd [#allocation3], 4294967264 }
  0x18   :  { %27 = sfence }
  0x19   :  { %v3059_v0 = vld [vmem:[%s3736_s3] sm:$0xff]  ;;  %vm113_vm0 = vcmask 1043456   ;;  %v2977_v2 = vmov 0.0   ;;  %vm100_vm1 = vcmask 31744   ;;  %v2978_v5 = vmov 0   ;;  %v65_v7 = vld [vmem:[%s3738_s5 + $0x8] sm:$0xff] }
  0x1a   :  { %v99_v1 = vcombine.high %v3059_v0, %v3059_v0  ;;  %182 = vmatprep.mubr.f32.mxu0 %v2977_v2  ;;  %v64_v3 = vld [vmem:[%s3738_s5] sm:$0xff]  ;;  %376 = vmatprep.mubr.f32.mxu1 %v2977_v2  ;;  %v59_v8 = vld [vmem:[%s3741_s8 + $0x8] sm:$0xff] }
  0x1b   :  { %v3071_v4 = vld [vmem:[%s3740_s7] sm:$0xff]  ;;  %2635 = vset.pattern.permute.xlu1 %v2978_v5  ;;  %2634 = vset.pattern.permute.xlu0 %v2978_v5  ;;  %v3091_v9 = vld [vmem:[%s3740_s7 + $0x8] sm:$0xff] }
  0x1c   :  { %v58_v6 = vld [vmem:[%s3741_s8] sm:$0xff]  ;;  %2460 = vmatprep.subr.msk.mxu0 %vm113_vm0, %v99_v1  ;;  %209 = vperm.xlu1 %2635, %v64_v3  }
  0x1d   :  { %2461 = vmatpush1.msk.msra.mxu0 %vm113_vm0, %v3059_v0  ;;  %80 = vperm.xlu0 %2634, %v58_v6  }
  0x1e   :  { %2462 = vmatmul.mubr.msk.f32.vlgmr.msra.gmra.mrb[0].mxu0 %vm100_vm1, %v3071_v4 }
  0x1f   :  { %188 = vmatprep.mubr.f32.mxu0 %v2977_v2 }
  0x20   :  { %28 = vsyncpa [#allocation7], 0  ;;  %214 = vperm.xlu1 %2635, %v65_v7   ;;  %v69_v10 = vld [vmem:[%s3739_s6 + $0x8] sm:$0xff]  ;;  %v68_v11 = vld [vmem:[%s3739_s6] sm:$0xff]  ;;  %vm308_vm2 = vcmask 261120   ;;  %s75_s16 = sld [smem:[#allocation5]] }
  0x21   :  { %85 = vperm.xlu0 %2634, %v59_v8   ;;  %v3105_v12 = vld [vmem:[%s3740_s7 + $0x10] sm:$0xff]  ;;  %v61_v13 = vld [vmem:[%s3741_s8 + $0x18] sm:$0xff]  ;;  %v2341_v20 = vld [vmem:[%s3745_s12] sm:$0x7]  ;;  %s74_s12 = sld [smem:[#allocation4]]  ;;  %s2459_s0 = sld [smem:[#allocation5 + $0x1]] }
  0x22   :  { %2463 = vmatmul.mubr.msk.f32.gmra.mrb[2].mxu0 %vm100_vm1, %v3091_v9  ;;  %v60_v14 = vld [vmem:[%s3741_s8 + $0x10] sm:$0xff]  ;;  %v3119_v15 = vld [vmem:[%s3740_s7 + $0x18] sm:$0xff]  ;;  %v63_v21 = vld [vmem:[%s3743_s10] sm:$0xf]  ;;  %s2458_s1 = sld [smem:[#allocation4 + $0x1]]  ;;  %s2470_s21 = sld [smem:[#allocation4 + $0x2]] }
  0x23   :  { %194 = vmatprep.mubr.f32.mxu0 %v2977_v2  ;;  %v67_v16 = vld [vmem:[%s3738_s5 + $0x18] sm:$0xff]  ;;  %v66_v17 = vld [vmem:[%s3738_s5 + $0x10] sm:$0xff]  ;;  %s2483_s22 = sld [smem:[#allocation5 + $0x3]]  ;;  %s2495_s24 = sld [smem:[#allocation5 + $0x4]] }
  0x24   :  { %250 = vperm.xlu1 %2635, %v69_v10   ;;  %v71_v18 = vld [vmem:[%s3739_s6 + $0x18] sm:$0xff]  ;;  %v70_v19 = vld [vmem:[%s3739_s6 + $0x10] sm:$0xff]  ;;  %s2482_s23 = sld [smem:[#allocation4 + $0x3]]  ;;  %s2494_s25 = sld [smem:[#allocation4 + $0x4]] }
  0x25   :  { %245 = vperm.xlu0 %2634, %v68_v11   ;;  %s2531_s17 = sld [smem:[#allocation5 + $0x7]]  ;;  %s2543_s19 = sld [smem:[#allocation5 + $0x8]] }
  0x26   :  { %2464 = vmatmul.mubr.msk.f32.gmra.mrb[4].mxu0 %vm100_vm1, %v3105_v12  ;;  %s2530_s18 = sld [smem:[#allocation4 + $0x7]]  ;;  %s2542_s20 = sld [smem:[#allocation4 + $0x8]] }
  0x27   :  { %200 = vmatprep.mubr.f32.mxu0 %v2977_v2 }
  0x28   :  { %95 = vperm.xlu1 %2635, %v61_v13  }
  0x29   :  { %90 = vperm.xlu0 %2634, %v60_v14  }
  0x2a   :  { %2465 = vmatmul.mubr.msk.f32.gmra.mrb[6].mxu0 %vm100_vm1, %v3119_v15 }
  0x2b   :  { %669 = vmatprep.mubr.f32.mxu0 %v2977_v2 }
  0x2c   :  { %224 = vperm.xlu1 %2635, %v67_v16  }
  0x2d   :  { %219 = vperm.xlu0 %2634, %v66_v17  }
  0x30   :  { %260 = vperm.xlu1 %2635, %v71_v18  }
  0x31   :  { %255 = vperm.xlu0 %2634, %v70_v19  }
  0x34   :  { %2344 = vperm.xlu1 %2635, %v2341_v20  }
  0x35   :  { %305 = vperm.xlu0 %2634, %v63_v21  }
  0x9b   :  { %v3144_v23 = vpop.permute.xlu1 %209 }
  0x9c   :  { %v3142_v22 = vpop.permute.xlu0 %80 }
  0x9f   :  { %v3148_v25 = vpop.permute.xlu1 %214 }
  0xa0   :  { %v3146_v24 = vpop.permute.xlu0 %85 }
  0xa3   :  { %v3152_v27 = vpop.permute.xlu1 %250 }
  0xa4   :  { %v3150_v26 = vpop.permute.xlu0 %245 }
  0xa7   :  { %v3157_v32 = vpop.permute.xlu1 %95 }
  0xa8   :  { %v3154_v28 = vpop.permute.xlu0 %90 }
  0xab   :  { %v3170_v45 = vpop.permute.xlu1 %224 }
  0xac   :  { %v3162_v36 = vpop.permute.xlu0 %219 }
  0xaf   :  { %v3183_v60 = vpop.permute.xlu1 %260 }
  0xb0   :  { %v3175_v51 = vpop.permute.xlu0 %255 }
  0xf1   :  { %v184_v29 = vpop.f32.mrb[0].mxu0 }
  0xf2   :  { %v185_v30 = vadd.f32 %v184_v29, %v3142_v22  ;;  %v186_v31 = vpop.f32.mrb[1].mxu0 }
  0xf3   :  { %v187_v33 = vadd.f32 %v186_v31, %v3142_v22 }
  0xf4   :  { %v227_v34 = vadd.f32 %v3144_v23, %v185_v30  ;;  %v263_v35 = vadd.f32 %v3150_v26, %v185_v30 }
  0xf5   :  { %v228_v37 = vadd.f32 %v3144_v23, %v187_v33  ;;  %v264_v38 = vadd.f32 %v3150_v26, %v187_v33  ;;  %v190_v39 = vpop.f32.mrb[2].mxu0 }
  0xf6   :  { %2637 = vtanh.f32 %v227_v34  ;;  %v191_v40 = vadd.f32 %v190_v39, %v3146_v24  ;;  %v192_v41 = vpop.f32.mrb[3].mxu0 }
  0xf7   :  { %2639 = vtanh.f32 %v263_v35  ;;  %v193_v42 = vadd.f32 %v192_v41, %v3146_v24 }
  0xf8   :  { %2641 = vtanh.f32 %v228_v37  ;;  %v229_v43 = vadd.f32 %v3148_v25, %v191_v40  ;;  %v265_v44 = vadd.f32 %v3152_v27, %v191_v40 }
  0xf9   :  { %2643 = vtanh.f32 %v264_v38  ;;  %v230_v46 = vadd.f32 %v3148_v25, %v193_v42  ;;  %v266_v47 = vadd.f32 %v3152_v27, %v193_v42  ;;  %v196_v48 = vpop.f32.mrb[4].mxu0 }
  0xfa   :  { %2645 = vtanh.f32 %v229_v43  ;;  %v197_v49 = vadd.f32 %v196_v48, %v3154_v28  ;;  %v198_v50 = vpop.f32.mrb[5].mxu0 }
  0xfb   :  { %2647 = vtanh.f32 %v265_v44  ;;  %v199_v52 = vadd.f32 %v198_v50, %v3154_v28 }
  0xfc   :  { %2649 = vtanh.f32 %v230_v46  ;;  %v231_v53 = vadd.f32 %v3162_v36, %v197_v49  ;;  %v267_v54 = vadd.f32 %v3175_v51, %v197_v49 }
  0xfd   :  { %2651 = vtanh.f32 %v266_v47  ;;  %v232_v55 = vadd.f32 %v3162_v36, %v199_v52  ;;  %v268_v56 = vadd.f32 %v3175_v51, %v199_v52  ;;  %v202_v57 = vpop.f32.mrb[6].mxu0 }
  0xfe   :  { %2653 = vtanh.f32 %v231_v53  ;;  %v203_v58 = vadd.f32 %v202_v57, %v3157_v32  ;;  %v204_v59 = vpop.f32.mrb[7].mxu0 }
  0xff   :  { %2655 = vtanh.f32 %v267_v54  ;;  %v205_v61 = vadd.f32 %v204_v59, %v3157_v32 }
 0x100   :  { %v2638_v62 = vpop.eup %2637  ;;  %2657 = vtanh.f32 %v232_v55  ;;  %v233_v63 = vadd.f32 %v3170_v45, %v203_v58  ;;  %v269_v1 = vadd.f32 %v3183_v60, %v203_v58 }
 0x101   :  { %v2640_v3 = vpop.eup %2639  ;;  %2659 = vtanh.f32 %v268_v56  ;;  %v234_v5 = vadd.f32 %v3170_v45, %v205_v61  ;;  %v270_v6 = vadd.f32 %v3183_v60, %v205_v61 }
 0x102   :  { %v2642_v7 = vpop.eup %2641  ;;  %2661 = vtanh.f32 %v233_v63  ;;  %v279_v8 = vsub.f32 %v2638_v62, %v2640_v3 }
 0x103   :  { %v2644_v10 = vpop.eup %2643  ;;  %2663 = vtanh.f32 %v269_v1  ;;  %v3193_v1 = vld [vmem:[%s3742_s9] sm:$0xf] }
 0x104   :  { %v2646_v11 = vpop.eup %2645  ;;  %2665 = vtanh.f32 %v234_v5  ;;  %v280_v13 = vsub.f32 %v2642_v7, %v2644_v10  ;;  %v287_v18 = vmul.f32 7.5, %v279_v8  ;;  %v3198_v5 = vpop.permute.xlu0 %305  ;;  %v383_v7 = vstv %s75_s16  ;;  %s2506_s16 = sld [smem:[#allocation4 + $0x5]] }
 0x105   :  { %v2648_v14 = vpop.eup %2647  ;;  %2667 = vtanh.f32 %v270_v6  ;;  %v3200_v8 = vstv %s2459_s0 }
 0x106   :  { %v2650_v16 = vpop.eup %2649  ;;  %v281_v17 = vsub.f32 %v2646_v11, %v2648_v14  ;;  %v288_v29 = vmul.f32 7.5, %v280_v13  ;;  %v295_v35 = vadd.f32 %v2640_v3, %v287_v18  ;;  %v391_v3 = vstv %s74_s12  ;;  %v3206_v13 = vld [vmem:[%s3735_s2] sm:$0xff]  ;;  %s2507_s12 = sld [smem:[#allocation5 + $0x5]] }
 0x107   :  { %v2652_v19 = vpop.eup %2651  ;;  %2669 = vrcp.f32 %v391_v3 }
 0x108   :  { %v2654_v20 = vpop.eup %2653  ;;  %v282_v21 = vsub.f32 %v2650_v16, %v2652_v19  ;;  %v289_v30 = vmul.f32 7.5, %v281_v17  ;;  %v296_v41 = vadd.f32 %v2644_v10, %v288_v29  ;;  %v410_v16 = vlaneseq }
 0x109   :  { %v2656_v31 = vpop.eup %2655 }
 0x10a   :  { %v2658_v33 = vpop.eup %2657  ;;  %v290_v34 = vmul.f32 7.5, %v282_v21  ;;  %v297_v37 = vadd.f32 %v2648_v14, %v289_v30  ;;  %v283_v38 = vsub.f32 %v2654_v20, %v2656_v31  ;;  %v3208_v14 = vstv %s2458_s1  ;;  %s2518_s1 = sld [smem:[#allocation4 + $0x6]] }
 0x10b   :  { %v2660_v39 = vpop.eup %2659  ;;  %v406_v29 = vmul.f32 %v3208_v14, %v3206_v13  ;;  %v407_v30 = vmul.f32 %v3200_v8, %v3059_v0 }
 0x10c   :  { %v2662_v40 = vpop.eup %2661  ;;  %v298_v42 = vadd.f32 %v2652_v19, %v290_v34  ;;  %v2567_v43 = vpack.c.bf16 %v297_v37, %v295_v35  ;;  %v284_v44 = vsub.f32 %v2658_v33, %v2660_v39  ;;  %v291_v50 = vmul.f32 7.5, %v283_v38  ;;  %v53_v37 = vld [vmem:[%s3737_s4] sm:$0x3]  ;;  %s2471_s4 = sld [smem:[#allocation5 + $0x2]] }
 0x10d   :  { %v2664_v46 = vpop.eup %2663 }
 0x10e   :  { %v2666_v47 = vpop.eup %2665  ;;  %v2565_v48 = vpack.c.bf16 %v298_v42, %v296_v41  ;;  %v285_v49 = vsub.f32 %v2662_v40, %v2664_v46  ;;  %v292_v54 = vmul.f32 7.5, %v284_v44  ;;  %v299_v57 = vadd.f32 %v2656_v31, %v291_v50 }
 0x10f   :  { %v2668_v52 = vpop.eup %2667  ;;  %v411_v31 = vshrl.u32 %v410_v16, 7  ;;  %v425_v41 = vsub.f32 1.0, %v53_v37 }
 0x110   :  { %2566 = vmatprep.subr.bf16.mxu1 %v2565_v48  ;;  %v286_v53 = vsub.f32 %v2666_v47, %v2668_v52  ;;  %v293_v55 = vmul.f32 7.5, %v285_v49  ;;  %v300_v59 = vadd.f32 %v2660_v39, %v292_v54  ;;  %v408_v39 = vadd.f32 %v407_v30, %v406_v29 }
 0x111   :  { %2568 = vmatpush1.bf16.msra.mxu1 %v2567_v43  ;;  %v2670_v35 = vpop.eup %2669  ;;  %v412_v40 = vsub.s32 0, %v411_v31  ;;  %v416_v43 = vsub.s32 1, %v411_v31 }
 0x112   :  { %v294_v56 = vmul.f32 7.5, %v286_v53  ;;  %v301_v58 = vadd.f32 %v2664_v46, %v293_v55  ;;  %v438_v46 = vcombine.high %v408_v39, %v408_v39 }
 0x113   :  { %v3221_v47 = vrot.slane %v425_v41, %v412_v40  ;;  %v3224_v49 = vrot.slane %v53_v37, %v412_v40  ;;  %v3226_v50 = vrot.slane %v425_v41, %v416_v43  ;;  %v3228_v53 = vrot.slane %v53_v37, %v416_v43 }
 0x114   :  { %v302_v61 = vadd.f32 %v2668_v52, %v294_v56  ;;  %v2571_v62 = vpack.c.bf16 %v301_v58, %v299_v57 }
 0x115   :  { %v440_v54 = vmul.f32 %v3221_v47, %v408_v39  ;;  %v441_v57 = vmul.f32 %v438_v46, %v3226_v50 }
 0x116   :  { %v2569_v63 = vpack.c.bf16 %v302_v61, %v300_v59 }
 0x118   :  { %2570 = vmatprep.subr.bf16.mxu1 %v2569_v63 }
 0x119   :  { %2572 = vmatpush1.bf16.msra.mxu1 %v2571_v62 }
 0x11c   :  { %2466 = vmatmul.mubr.msk.f32.vlgmr.msra.gmra.mrb[0].mxu1 %vm308_vm2, %v3193_v1 }
 0x11d   :  { %524 = vmatprep.mubr.f32.mxu1 %v2977_v2 }
 0x1ef   :  { %v378_v6 = vpop.f32.mrb[0].mxu1 }
 0x1f0   :  { %v379_v10 = vadd.f32 %v378_v6, %v3198_v5  ;;  %v380_v11 = vpop.f32.mrb[1].mxu1 }
 0x1f1   :  { %v381_v17 = vadd.f32 %v380_v11, %v3198_v5 }
 0x1f2   :  { %v384_v18 = vmul.f32 %v383_v7, %v379_v10  ;;  %v399_v19 = vmul.f32 %v3200_v8, %v379_v10 }
 0x1f3   :  { %v385_v20 = vmul.f32 %v383_v7, %v381_v17  ;;  %v400_v21 = vmul.f32 %v3200_v8, %v381_v17 }
 0x1f5   :  { %v388_v33 = vcombine.low %v384_v18, %v385_v20  ;;  %v403_v34 = vcombine.low %v399_v19, %v400_v21 }
 0x1f7   :  { %v390_v38 = vsub.f32 %v3059_v0, %v388_v33 }
 0x1f9   :  { %v393_v42 = vmul.f32 %v2670_v35, %v390_v38 }
 0x1fb   :  { %v2467_v44 = vclamps-f32 %v393_v42, 1.0 }
 0x1fd   :  { %v397_v48 = vmul.f32 %v2467_v44, %v3208_v14 }
 0x1ff   :  { %v405_v52 = vadd.f32 %v403_v34, %v397_v48 }
 0x201   :  { %v421_v55 = vcombine.high %v405_v52, %v405_v52  ;;  %v423_v56 = vmul.f32 %v3224_v49, %v405_v52 }
 0x203   :  { %v424_v58 = vmul.f32 %v421_v55, %v3228_v53  ;;  %v442_v59 = vadd.f32 %v440_v54, %v423_v56 }
 0x205   :  { %v443_v61 = vadd.f32 %v441_v57, %v424_v58 }
 0x207   :  { %v3234_v62 = vcombine.low %v442_v59, %v443_v61  ;;  %v2557_v63 = vcombine.low %v443_v61, %v443_v61 }
 0x209   :  { %2472 = vmatprep.subr.msk.mxu1 %vm113_vm0, %v2557_v63 }
 0x20a   :  { %2473 = vmatpush1.msk.msra.mxu1 %vm113_vm0, %v3234_v62 }
 0x20b   :  { %2474 = vmatmul.mubr.msk.f32.vlgmr.msra.gmra.mrb[2].mxu1 %vm100_vm1, %v3071_v4 }
 0x20c   :  { %530 = vmatprep.mubr.f32.mxu1 %v2977_v2 }
 0x20f   :  { %2475 = vmatmul.mubr.msk.f32.gmra.mrb[4].mxu1 %vm100_vm1, %v3091_v9 }
 0x210   :  { %536 = vmatprep.mubr.f32.mxu1 %v2977_v2 }
 0x213   :  { %2476 = vmatmul.mubr.msk.f32.gmra.mrb[6].mxu1 %vm100_vm1, %v3105_v12 }
 0x214   :  { %542 = vmatprep.mubr.f32.mxu1 %v2977_v2 }
 0x217   :  { %2477 = vmatmul.mubr.msk.f32.gmra.mrb[8].mxu1 %vm100_vm1, %v3119_v15 }
 0x218   :  { %939 = vmatprep.mubr.f32.mxu1 %v2977_v2 }
 0x2de   :  { %v526_v3 = vpop.f32.mrb[2].mxu1 }
 0x2df   :  { %v527_v6 = vadd.f32 %v526_v3, %v3142_v22  ;;  %v528_v7 = vpop.f32.mrb[3].mxu1 }
 0x2e0   :  { %v529_v10 = vadd.f32 %v528_v7, %v3142_v22 }
 0x2e1   :  { %v549_v11 = vadd.f32 %v527_v6, %v3144_v23  ;;  %v565_v16 = vadd.f32 %v527_v6, %v3150_v26 }
 0x2e2   :  { %v550_v17 = vadd.f32 %v529_v10, %v3144_v23  ;;  %v566_v18 = vadd.f32 %v529_v10, %v3150_v26  ;;  %v532_v19 = vpop.f32.mrb[4].mxu1 }
 0x2e3   :  { %2671 = vtanh.f32 %v549_v11  ;;  %v533_v20 = vadd.f32 %v532_v19, %v3146_v24  ;;  %v534_v21 = vpop.f32.mrb[5].mxu1 }
 0x2e4   :  { %2673 = vtanh.f32 %v565_v16  ;;  %v535_v29 = vadd.f32 %v534_v21, %v3146_v24 }
 0x2e5   :  { %2675 = vtanh.f32 %v550_v17  ;;  %v551_v30 = vadd.f32 %v533_v20, %v3148_v25  ;;  %v567_v31 = vadd.f32 %v533_v20, %v3152_v27 }
 0x2e6   :  { %2677 = vtanh.f32 %v566_v18  ;;  %v552_v33 = vadd.f32 %v535_v29, %v3148_v25  ;;  %v568_v34 = vadd.f32 %v535_v29, %v3152_v27  ;;  %v538_v35 = vpop.f32.mrb[6].mxu1 }
 0x2e7   :  { %2679 = vtanh.f32 %v551_v30  ;;  %v539_v37 = vadd.f32 %v538_v35, %v3154_v28  ;;  %v540_v38 = vpop.f32.mrb[7].mxu1 }
 0x2e8   :  { %2681 = vtanh.f32 %v567_v31  ;;  %v541_v39 = vadd.f32 %v540_v38, %v3154_v28 }
 0x2e9   :  { %2683 = vtanh.f32 %v552_v33  ;;  %v553_v40 = vadd.f32 %v539_v37, %v3162_v36  ;;  %v569_v41 = vadd.f32 %v539_v37, %v3175_v51 }
 0x2ea   :  { %2685 = vtanh.f32 %v568_v34  ;;  %v554_v42 = vadd.f32 %v541_v39, %v3162_v36  ;;  %v570_v43 = vadd.f32 %v541_v39, %v3175_v51  ;;  %v544_v44 = vpop.f32.mrb[8].mxu1 }
 0x2eb   :  { %2687 = vtanh.f32 %v553_v40  ;;  %v545_v46 = vadd.f32 %v544_v44, %v3157_v32  ;;  %v546_v48 = vpop.f32.mrb[9].mxu1 }
 0x2ec   :  { %2689 = vtanh.f32 %v569_v41  ;;  %v547_v52 = vadd.f32 %v546_v48, %v3157_v32 }
 0x2ed   :  { %v2672_v54 = vpop.eup %2671  ;;  %2691 = vtanh.f32 %v554_v42  ;;  %v555_v55 = vadd.f32 %v545_v46, %v3170_v45  ;;  %v571_v56 = vadd.f32 %v545_v46, %v3183_v60 }
 0x2ee   :  { %v2674_v57 = vpop.eup %2673  ;;  %2693 = vtanh.f32 %v570_v43  ;;  %v556_v58 = vadd.f32 %v547_v52, %v3170_v45  ;;  %v572_v59 = vadd.f32 %v547_v52, %v3183_v60 }
 0x2ef   :  { %v2676_v61 = vpop.eup %2675  ;;  %2695 = vtanh.f32 %v555_v55  ;;  %v581_v63 = vsub.f32 %v2672_v54, %v2674_v57 }
 0x2f0   :  { %v2678_v3 = vpop.eup %2677  ;;  %2697 = vtanh.f32 %v571_v56 }
 0x2f1   :  { %v2680_v6 = vpop.eup %2679  ;;  %2699 = vtanh.f32 %v556_v58  ;;  %v582_v7 = vsub.f32 %v2676_v61, %v2678_v3  ;;  %v589_v17 = vmul.f32 7.5, %v581_v63 }
 0x2f2   :  { %v2682_v10 = vpop.eup %2681  ;;  %2701 = vtanh.f32 %v572_v59 }
 0x2f3   :  { %v2684_v11 = vpop.eup %2683  ;;  %v583_v16 = vsub.f32 %v2680_v6, %v2682_v10  ;;  %v590_v21 = vmul.f32 7.5, %v582_v7  ;;  %v597_v34 = vadd.f32 %v2674_v57, %v589_v17  ;;  %2703 = vrcp.f32 %v3208_v14 }
 0x2f4   :  { %v2686_v18 = vpop.eup %2685 }
 0x2f5   :  { %v2688_v19 = vpop.eup %2687  ;;  %v584_v20 = vsub.f32 %v2684_v11, %v2686_v18  ;;  %v591_v29 = vmul.f32 7.5, %v583_v16  ;;  %v598_v40 = vadd.f32 %v2678_v3, %v590_v21  ;;  %v3279_v16 = vstv %s2471_s4 }
 0x2f6   :  { %v2690_v30 = vpop.eup %2689  ;;  %v3284_v21 = vstv %s2470_s21 }
 0x2f7   :  { %v2692_v31 = vpop.eup %2691  ;;  %v592_v33 = vmul.f32 7.5, %v584_v20  ;;  %v599_v35 = vadd.f32 %v2682_v10, %v591_v29  ;;  %v585_v37 = vsub.f32 %v2688_v19, %v2690_v30  ;;  %v699_v14 = vmul.f32 %v3284_v21, %v3206_v13 }
 0x2f8   :  { %v2694_v38 = vpop.eup %2693 }
 0x2f9   :  { %v2696_v39 = vpop.eup %2695  ;;  %v600_v41 = vadd.f32 %v2686_v18, %v592_v33  ;;  %v2575_v42 = vpack.c.bf16 %v599_v35, %v597_v34  ;;  %v586_v43 = vsub.f32 %v2692_v31, %v2694_v38  ;;  %v593_v54 = vmul.f32 7.5, %v585_v37 }
 0x2fa   :  { %v2698_v44 = vpop.eup %2697  ;;  %v700_v33 = vmul.f32 %v3279_v16, %v3059_v0 }
 0x2fb   :  { %v2700_v46 = vpop.eup %2699  ;;  %v2573_v48 = vpack.c.bf16 %v600_v41, %v598_v40  ;;  %v587_v52 = vsub.f32 %v2696_v39, %v2698_v44  ;;  %v594_v58 = vmul.f32 7.5, %v586_v43  ;;  %v601_v61 = vadd.f32 %v2690_v30, %v593_v54 }
 0x2fc   :  { %v2702_v55 = vpop.eup %2701  ;;  %v701_v39 = vadd.f32 %v700_v33, %v699_v14 }
 0x2fd   :  { %2574 = vmatprep.subr.bf16.mxu0 %v2573_v48  ;;  %v588_v56 = vsub.f32 %v2700_v46, %v2702_v55  ;;  %v595_v59 = vmul.f32 7.5, %v587_v52  ;;  %v602_v6 = vadd.f32 %v2694_v38, %v594_v58  ;;  %v2704_v37 = vpop.eup %2703 }
 0x2fe   :  { %2576 = vmatpush1.bf16.msra.mxu0 %v2575_v42  ;;  %v708_v42 = vcombine.high %v701_v39, %v701_v39 }
 0x2ff   :  { %v596_v57 = vmul.f32 7.5, %v588_v56  ;;  %v603_v63 = vadd.f32 %v2698_v44, %v595_v59  ;;  %v710_v44 = vmul.f32 %v701_v39, %v3221_v47 }
 0x300   :  { %v711_v52 = vmul.f32 %v708_v42, %v3226_v50 }
 0x301   :  { %v604_v7 = vadd.f32 %v2702_v55, %v596_v57  ;;  %v2579_v3 = vpack.c.bf16 %v603_v63, %v601_v61 }
 0x303   :  { %v2577_v10 = vpack.c.bf16 %v604_v7, %v602_v6 }
 0x305   :  { %2578 = vmatprep.subr.bf16.mxu0 %v2577_v10 }
 0x306   :  { %2580 = vmatpush1.bf16.msra.mxu0 %v2579_v3 }
 0x309   :  { %2478 = vmatmul.mubr.msk.f32.vlgmr.msra.gmra.mrb[8].mxu0 %vm308_vm2, %v3193_v1 }
 0x30a   :  { %794 = vmatprep.mubr.f32.mxu0 %v2977_v2 }
 0x3dc   :  { %v671_v11 = vpop.f32.mrb[8].mxu0 }
 0x3dd   :  { %v672_v17 = vadd.f32 %v671_v11, %v3198_v5  ;;  %v673_v18 = vpop.f32.mrb[9].mxu0 }
 0x3de   :  { %v674_v19 = vadd.f32 %v673_v18, %v3198_v5 }
 0x3df   :  { %v677_v20 = vmul.f32 %v672_v17, %v3200_v8  ;;  %v692_v29 = vmul.f32 %v3279_v16, %v672_v17 }
 0x3e0   :  { %v678_v30 = vmul.f32 %v674_v19, %v3200_v8  ;;  %v693_v31 = vmul.f32 %v3279_v16, %v674_v19 }
 0x3e2   :  { %v681_v34 = vcombine.low %v677_v20, %v678_v30  ;;  %v696_v35 = vcombine.low %v692_v29, %v693_v31 }
 0x3e4   :  { %v683_v38 = vsub.f32 %v3234_v62, %v681_v34 }
 0x3e6   :  { %v686_v40 = vmul.f32 %v2704_v37, %v683_v38 }
 0x3e8   :  { %v2479_v41 = vclamps-f32 %v686_v40, 1.0 }
 0x3ea   :  { %v690_v43 = vmul.f32 %v2479_v41, %v3284_v21 }
 0x3ec   :  { %v698_v8 = vadd.f32 %v696_v35, %v690_v43 }
 0x3ee   :  { %v703_v46 = vcombine.high %v698_v8, %v698_v8  ;;  %v705_v48 = vmul.f32 %v698_v8, %v3224_v49 }
 0x3f0   :  { %v706_v54 = vmul.f32 %v703_v46, %v3228_v53  ;;  %v712_v55 = vadd.f32 %v710_v44, %v705_v48 }
 0x3f2   :  { %v713_v56 = vadd.f32 %v711_v52, %v706_v54 }
 0x3f4   :  { %v3299_v58 = vcombine.low %v712_v55, %v713_v56  ;;  %v2558_v62 = vcombine.low %v713_v56, %v713_v56 }
 0x3f6   :  { %2484 = vmatprep.subr.msk.mxu0 %vm113_vm0, %v2558_v62 }
 0x3f7   :  { %2485 = vmatpush1.msk.msra.mxu0 %vm113_vm0, %v3299_v58 }
 0x3f8   :  { %2486 = vmatmul.mubr.msk.f32.vlgmr.msra.gmra.mrb[10].mxu0 %vm100_vm1, %v3071_v4 }
 0x3f9   :  { %800 = vmatprep.mubr.f32.mxu0 %v2977_v2 }
 0x3fc   :  { %2487 = vmatmul.mubr.msk.f32.gmra.mrb[12].mxu0 %vm100_vm1, %v3091_v9 }
 0x3fd   :  { %806 = vmatprep.mubr.f32.mxu0 %v2977_v2 }
 0x400   :  { %2488 = vmatmul.mubr.msk.f32.gmra.mrb[14].mxu0 %vm100_vm1, %v3105_v12 }
 0x401   :  { %812 = vmatprep.mubr.f32.mxu0 %v2977_v2 }
 0x404   :  { %2489 = vmatmul.mubr.msk.f32.gmra.mrb[16].mxu0 %vm100_vm1, %v3119_v15 }
 0x405   :  { %1209 = vmatprep.mubr.f32.mxu0 %v2977_v2 }
 0x4cb   :  { %v796_v59 = vpop.f32.mrb[10].mxu0 }
 0x4cc   :  { %v797_v57 = vadd.f32 %v796_v59, %v3142_v22  ;;  %v798_v61 = vpop.f32.mrb[11].mxu0 }
 0x4cd   :  { %v799_v63 = vadd.f32 %v798_v61, %v3142_v22 }
 0x4ce   :  { %v819_v6 = vadd.f32 %v797_v57, %v3144_v23  ;;  %v835_v7 = vadd.f32 %v797_v57, %v3150_v26 }
 0x4cf   :  { %v820_v3 = vadd.f32 %v799_v63, %v3144_v23  ;;  %v836_v10 = vadd.f32 %v799_v63, %v3150_v26  ;;  %v802_v11 = vpop.f32.mrb[12].mxu0 }
 0x4d0   :  { %2705 = vtanh.f32 %v819_v6  ;;  %v803_v17 = vadd.f32 %v802_v11, %v3146_v24  ;;  %v804_v18 = vpop.f32.mrb[13].mxu0 }
 0x4d1   :  { %2707 = vtanh.f32 %v835_v7  ;;  %v805_v19 = vadd.f32 %v804_v18, %v3146_v24 }
 0x4d2   :  { %2709 = vtanh.f32 %v820_v3  ;;  %v821_v20 = vadd.f32 %v803_v17, %v3148_v25  ;;  %v837_v29 = vadd.f32 %v803_v17, %v3152_v27 }
 0x4d3   :  { %2711 = vtanh.f32 %v836_v10  ;;  %v822_v30 = vadd.f32 %v805_v19, %v3148_v25  ;;  %v838_v31 = vadd.f32 %v805_v19, %v3152_v27  ;;  %v808_v14 = vpop.f32.mrb[14].mxu0 }
 0x4d4   :  { %2713 = vtanh.f32 %v821_v20  ;;  %v809_v33 = vadd.f32 %v808_v14, %v3154_v28  ;;  %v810_v34 = vpop.f32.mrb[15].mxu0 }
 0x4d5   :  { %2715 = vtanh.f32 %v837_v29  ;;  %v811_v35 = vadd.f32 %v810_v34, %v3154_v28 }
 0x4d6   :  { %2717 = vtanh.f32 %v822_v30  ;;  %v823_v37 = vadd.f32 %v809_v33, %v3162_v36  ;;  %v839_v38 = vadd.f32 %v809_v33, %v3175_v51 }
 0x4d7   :  { %2719 = vtanh.f32 %v838_v31  ;;  %v824_v39 = vadd.f32 %v811_v35, %v3162_v36  ;;  %v840_v40 = vadd.f32 %v811_v35, %v3175_v51  ;;  %v814_v41 = vpop.f32.mrb[16].mxu0 }
 0x4d8   :  { %2721 = vtanh.f32 %v823_v37  ;;  %v815_v42 = vadd.f32 %v814_v41, %v3157_v32  ;;  %v816_v43 = vpop.f32.mrb[17].mxu0 }
 0x4d9   :  { %2723 = vtanh.f32 %v839_v38  ;;  %v817_v8 = vadd.f32 %v816_v43, %v3157_v32 }
 0x4da   :  { %v2706_v44 = vpop.eup %2705  ;;  %2725 = vtanh.f32 %v824_v39  ;;  %v825_v46 = vadd.f32 %v815_v42, %v3170_v45  ;;  %v841_v48 = vadd.f32 %v815_v42, %v3183_v60 }
 0x4db   :  { %v2708_v52 = vpop.eup %2707  ;;  %2727 = vtanh.f32 %v840_v40  ;;  %v826_v54 = vadd.f32 %v817_v8, %v3170_v45  ;;  %v842_v55 = vadd.f32 %v817_v8, %v3183_v60 }
 0x4dc   :  { %v2710_v56 = vpop.eup %2709  ;;  %2729 = vtanh.f32 %v825_v46  ;;  %v851_v62 = vsub.f32 %v2706_v44, %v2708_v52 }
 0x4dd   :  { %v2712_v59 = vpop.eup %2711  ;;  %2731 = vtanh.f32 %v841_v48 }
 0x4de   :  { %v2714_v57 = vpop.eup %2713  ;;  %2733 = vtanh.f32 %v826_v54  ;;  %v852_v61 = vsub.f32 %v2710_v56, %v2712_v59  ;;  %v859_v3 = vmul.f32 7.5, %v851_v62 }
 0x4df   :  { %v2716_v63 = vpop.eup %2715  ;;  %2735 = vtanh.f32 %v842_v55 }
 0x4e0   :  { %v2718_v6 = vpop.eup %2717  ;;  %v853_v7 = vsub.f32 %v2714_v57, %v2716_v63  ;;  %v860_v18 = vmul.f32 7.5, %v852_v61  ;;  %v867_v31 = vadd.f32 %v2708_v52, %v859_v3  ;;  %2737 = vrcp.f32 %v3284_v21 }
 0x4e1   :  { %v2720_v10 = vpop.eup %2719 }
 0x4e2   :  { %v2722_v11 = vpop.eup %2721  ;;  %v854_v17 = vsub.f32 %v2718_v6, %v2720_v10  ;;  %v861_v19 = vmul.f32 7.5, %v853_v7  ;;  %v868_v37 = vadd.f32 %v2712_v59, %v860_v18  ;;  %v3344_v7 = vstv %s2483_s22 }
 0x4e3   :  { %v2724_v20 = vpop.eup %2723  ;;  %v3349_v18 = vstv %s2482_s23 }
 0x4e4   :  { %v2726_v29 = vpop.eup %2725  ;;  %v862_v30 = vmul.f32 7.5, %v854_v17  ;;  %v869_v14 = vadd.f32 %v2716_v63, %v861_v19  ;;  %v855_v33 = vsub.f32 %v2722_v11, %v2724_v20  ;;  %v969_v21 = vmul.f32 %v3349_v18, %v3206_v13 }
 0x4e5   :  { %v2728_v34 = vpop.eup %2727 }
 0x4e6   :  { %v2730_v35 = vpop.eup %2729  ;;  %v870_v38 = vadd.f32 %v2720_v10, %v862_v30  ;;  %v2583_v39 = vpack.c.bf16 %v869_v14, %v867_v31  ;;  %v856_v40 = vsub.f32 %v2726_v29, %v2728_v34  ;;  %v863_v44 = vmul.f32 7.5, %v855_v33 }
 0x4e7   :  { %v2732_v41 = vpop.eup %2731  ;;  %v970_v30 = vmul.f32 %v3344_v7, %v3059_v0 }
 0x4e8   :  { %v2734_v42 = vpop.eup %2733  ;;  %v2581_v43 = vpack.c.bf16 %v870_v38, %v868_v37  ;;  %v857_v8 = vsub.f32 %v2730_v35, %v2732_v41  ;;  %v864_v54 = vmul.f32 7.5, %v856_v40  ;;  %v871_v56 = vadd.f32 %v2724_v20, %v863_v44 }
 0x4e9   :  { %v2736_v46 = vpop.eup %2735  ;;  %v971_v35 = vadd.f32 %v970_v30, %v969_v21 }
 0x4ea   :  { %2582 = vmatprep.subr.bf16.mxu1 %v2581_v43  ;;  %v858_v48 = vsub.f32 %v2734_v42, %v2736_v46  ;;  %v865_v55 = vmul.f32 7.5, %v857_v8  ;;  %v872_v57 = vadd.f32 %v2728_v34, %v864_v54  ;;  %v2738_v33 = vpop.eup %2737 }
 0x4eb   :  { %2584 = vmatpush1.bf16.msra.mxu1 %v2583_v39  ;;  %v978_v39 = vcombine.high %v971_v35, %v971_v35 }
 0x4ec   :  { %v866_v52 = vmul.f32 7.5, %v858_v48  ;;  %v873_v62 = vadd.f32 %v2732_v41, %v865_v55  ;;  %v980_v41 = vmul.f32 %v971_v35, %v3221_v47 }
 0x4ed   :  { %v981_v8 = vmul.f32 %v978_v39, %v3226_v50 }
 0x4ee   :  { %v874_v61 = vadd.f32 %v2736_v46, %v866_v52  ;;  %v2587_v59 = vpack.c.bf16 %v873_v62, %v871_v56 }
 0x4f0   :  { %v2585_v63 = vpack.c.bf16 %v874_v61, %v872_v57 }
 0x4f2   :  { %2586 = vmatprep.subr.bf16.mxu1 %v2585_v63 }
 0x4f3   :  { %2588 = vmatpush1.bf16.msra.mxu1 %v2587_v59 }
 0x4f6   :  { %2490 = vmatmul.mubr.msk.f32.vlgmr.msra.gmra.mrb[10].mxu1 %vm308_vm2, %v3193_v1 }
 0x4f7   :  { %1064 = vmatprep.mubr.f32.mxu1 %v2977_v2 }
 0x5c9   :  { %v941_v6 = vpop.f32.mrb[10].mxu1 }
 0x5ca   :  { %v942_v3 = vadd.f32 %v941_v6, %v3198_v5  ;;  %v943_v10 = vpop.f32.mrb[11].mxu1 }
 0x5cb   :  { %v944_v11 = vadd.f32 %v943_v10, %v3198_v5 }
 0x5cc   :  { %v947_v17 = vmul.f32 %v942_v3, %v3279_v16  ;;  %v962_v19 = vmul.f32 %v3344_v7, %v942_v3 }
 0x5cd   :  { %v948_v20 = vmul.f32 %v944_v11, %v3279_v16  ;;  %v963_v29 = vmul.f32 %v3344_v7, %v944_v11 }
 0x5cf   :  { %v951_v31 = vcombine.low %v947_v17, %v948_v20  ;;  %v966_v14 = vcombine.low %v962_v19, %v963_v29 }
 0x5d1   :  { %v953_v34 = vsub.f32 %v3299_v58, %v951_v31 }
 0x5d3   :  { %v956_v37 = vmul.f32 %v2738_v33, %v953_v34 }
 0x5d5   :  { %v2491_v38 = vclamps-f32 %v956_v37, 1.0 }
 0x5d7   :  { %v960_v40 = vmul.f32 %v2491_v38, %v3349_v18 }
 0x5d9   :  { %v968_v16 = vadd.f32 %v966_v14, %v960_v40 }
 0x5db   :  { %v973_v42 = vcombine.high %v968_v16, %v968_v16  ;;  %v975_v43 = vmul.f32 %v968_v16, %v3224_v49 }
 0x5dd   :  { %v976_v0 = vmul.f32 %v973_v42, %v3228_v53  ;;  %v982_v44 = vadd.f32 %v980_v41, %v975_v43 }
 0x5df   :  { %v983_v46 = vadd.f32 %v981_v8, %v976_v0 }
 0x5e1   :  { %v3364_v48 = vcombine.low %v982_v44, %v983_v46  ;;  %v2559_v58 = vcombine.low %v983_v46, %v983_v46 }
 0x5e3   :  { %2496 = vmatprep.subr.msk.mxu1 %vm113_vm0, %v2559_v58 }
 0x5e4   :  { %2497 = vmatpush1.msk.msra.mxu1 %vm113_vm0, %v3364_v48 }
 0x5e5   :  { %2498 = vmatmul.mubr.msk.f32.vlgmr.msra.gmra.mrb[12].mxu1 %vm100_vm1, %v3071_v4 }
 0x5e6   :  { %1070 = vmatprep.mubr.f32.mxu1 %v2977_v2 }
 0x5e9   :  { %2499 = vmatmul.mubr.msk.f32.gmra.mrb[14].mxu1 %vm100_vm1, %v3091_v9 }
 0x5ea   :  { %1076 = vmatprep.mubr.f32.mxu1 %v2977_v2 }
 0x5ed   :  { %2500 = vmatmul.mubr.msk.f32.gmra.mrb[16].mxu1 %vm100_vm1, %v3105_v12 }
 0x5ee   :  { %1082 = vmatprep.mubr.f32.mxu1 %v2977_v2 }
 0x5f1   :  { %2501 = vmatmul.mubr.msk.f32.gmra.mrb[18].mxu1 %vm100_vm1, %v3119_v15 }
 0x5f2   :  { %1479 = vmatprep.mubr.f32.mxu1 %v2977_v2 }
 0x6b8   :  { %v1066_v54 = vpop.f32.mrb[12].mxu1 }
 0x6b9   :  { %v1067_v4 = vadd.f32 %v1066_v54, %v3142_v22  ;;  %v1068_v55 = vpop.f32.mrb[13].mxu1 }
 0x6ba   :  { %v1069_v52 = vadd.f32 %v1068_v55, %v3142_v22 }
 0x6bb   :  { %v1089_v9 = vadd.f32 %v1067_v4, %v3144_v23  ;;  %v1105_v56 = vadd.f32 %v1067_v4, %v3150_v26 }
 0x6bc   :  { %v1090_v62 = vadd.f32 %v1069_v52, %v3144_v23  ;;  %v1106_v12 = vadd.f32 %v1069_v52, %v3150_v26  ;;  %v1072_v57 = vpop.f32.mrb[14].mxu1 }
 0x6bd   :  { %2739 = vtanh.f32 %v1089_v9  ;;  %v1073_v15 = vadd.f32 %v1072_v57, %v3146_v24  ;;  %v1074_v61 = vpop.f32.mrb[15].mxu1 }
 0x6be   :  { %2741 = vtanh.f32 %v1105_v56  ;;  %v1075_v59 = vadd.f32 %v1074_v61, %v3146_v24 }
 0x6bf   :  { %2743 = vtanh.f32 %v1090_v62  ;;  %v1091_v63 = vadd.f32 %v1073_v15, %v3148_v25  ;;  %v1107_v6 = vadd.f32 %v1073_v15, %v3152_v27 }
 0x6c0   :  { %2745 = vtanh.f32 %v1106_v12  ;;  %v1092_v3 = vadd.f32 %v1075_v59, %v3148_v25  ;;  %v1108_v10 = vadd.f32 %v1075_v59, %v3152_v27  ;;  %v1078_v11 = vpop.f32.mrb[16].mxu1 }
 0x6c1   :  { %2747 = vtanh.f32 %v1091_v63  ;;  %v1079_v17 = vadd.f32 %v1078_v11, %v3154_v28  ;;  %v1080_v19 = vpop.f32.mrb[17].mxu1 }
 0x6c2   :  { %2749 = vtanh.f32 %v1107_v6  ;;  %v1081_v20 = vadd.f32 %v1080_v19, %v3154_v28 }
 0x6c3   :  { %2751 = vtanh.f32 %v1092_v3  ;;  %v1093_v29 = vadd.f32 %v1079_v17, %v3162_v36  ;;  %v1109_v21 = vadd.f32 %v1079_v17, %v3175_v51 }
 0x6c4   :  { %2753 = vtanh.f32 %v1108_v10  ;;  %v1094_v30 = vadd.f32 %v1081_v20, %v3162_v36  ;;  %v1110_v31 = vadd.f32 %v1081_v20, %v3175_v51  ;;  %v1084_v14 = vpop.f32.mrb[18].mxu1 }
 0x6c5   :  { %2755 = vtanh.f32 %v1093_v29  ;;  %v1085_v33 = vadd.f32 %v1084_v14, %v3157_v32  ;;  %v1086_v34 = vpop.f32.mrb[19].mxu1 }
 0x6c6   :  { %2757 = vtanh.f32 %v1109_v21  ;;  %v1087_v35 = vadd.f32 %v1086_v34, %v3157_v32 }
 0x6c7   :  { %v2740_v37 = vpop.eup %2739  ;;  %2759 = vtanh.f32 %v1094_v30  ;;  %v1095_v38 = vadd.f32 %v1085_v33, %v3170_v45  ;;  %v1111_v39 = vadd.f32 %v1085_v33, %v3183_v60 }
 0x6c8   :  { %v2742_v40 = vpop.eup %2741  ;;  %2761 = vtanh.f32 %v1110_v31  ;;  %v1096_v16 = vadd.f32 %v1087_v35, %v3170_v45  ;;  %v1112_v41 = vadd.f32 %v1087_v35, %v3183_v60 }
 0x6c9   :  { %v2744_v42 = vpop.eup %2743  ;;  %2763 = vtanh.f32 %v1095_v38  ;;  %v1121_v43 = vsub.f32 %v2740_v37, %v2742_v40 }
 0x6ca   :  { %v2746_v8 = vpop.eup %2745  ;;  %2765 = vtanh.f32 %v1111_v39 }
 0x6cb   :  { %v2748_v0 = vpop.eup %2747  ;;  %2767 = vtanh.f32 %v1096_v16  ;;  %v1122_v44 = vsub.f32 %v2744_v42, %v2746_v8  ;;  %v1129_v4 = vmul.f32 7.5, %v1121_v43 }
 0x6cc   :  { %v2750_v46 = vpop.eup %2749  ;;  %2769 = vtanh.f32 %v1112_v41 }
 0x6cd   :  { %v2752_v58 = vpop.eup %2751  ;;  %v1123_v54 = vsub.f32 %v2748_v0, %v2750_v46  ;;  %v1130_v56 = vmul.f32 7.5, %v1122_v44  ;;  %v1137_v61 = vadd.f32 %v2742_v40, %v1129_v4  ;;  %2771 = vrcp.f32 %v3349_v18 }
 0x6ce   :  { %v2754_v55 = vpop.eup %2753 }
 0x6cf   :  { %v2756_v52 = vpop.eup %2755  ;;  %v1124_v9 = vsub.f32 %v2752_v58, %v2754_v55  ;;  %v1131_v62 = vmul.f32 7.5, %v1123_v54  ;;  %v1138_v10 = vadd.f32 %v2746_v8, %v1130_v56  ;;  %v3409_v8 = vstv %s2495_s24 }
 0x6d0   :  { %v2758_v12 = vpop.eup %2757  ;;  %v3414_v54 = vstv %s2494_s25 }
 0x6d1   :  { %v2760_v57 = vpop.eup %2759  ;;  %v1132_v15 = vmul.f32 7.5, %v1124_v9  ;;  %v1139_v59 = vadd.f32 %v2750_v46, %v1131_v62  ;;  %v1125_v63 = vsub.f32 %v2756_v52, %v2758_v12  ;;  %v1239_v18 = vmul.f32 %v3414_v54, %v3206_v13  ;;  %v3424_v52 = vld [vmem:[%s3736_s3] sm:$0xff] }
 0x6d2   :  { %v2762_v6 = vpop.eup %2761  ;;  %v1240_v9 = vmul.f32 %v3424_v52, %v3409_v8 }
 0x6d3   :  { %v2764_v3 = vpop.eup %2763  ;;  %v1140_v11 = vadd.f32 %v2754_v55, %v1132_v15  ;;  %v2591_v17 = vpack.c.bf16 %v1139_v59, %v1137_v61  ;;  %v1126_v19 = vsub.f32 %v2760_v57, %v2762_v6  ;;  %v1133_v31 = vmul.f32 7.5, %v1125_v63 }
 0x6d4   :  { %v2766_v20 = vpop.eup %2765  ;;  %v1241_v15 = vadd.f32 %v1240_v9, %v1239_v18 }
 0x6d5   :  { %v2768_v29 = vpop.eup %2767  ;;  %v2589_v21 = vpack.c.bf16 %v1140_v11, %v1138_v10  ;;  %v1127_v30 = vsub.f32 %v2764_v3, %v2766_v20  ;;  %v1134_v34 = vmul.f32 7.5, %v1126_v19  ;;  %v1141_v38 = vadd.f32 %v2758_v12, %v1133_v31  ;;  %v3458_v31 = vld [vmem:[%s3740_s7 + $0x10] sm:$0xff] }
 0x6d6   :  { %v2770_v14 = vpop.eup %2769  ;;  %v1248_v59 = vcombine.high %v1241_v15, %v1241_v15 }
 0x6d7   :  { %2590 = vmatprep.subr.bf16.mxu0 %v2589_v21  ;;  %v1128_v33 = vsub.f32 %v2768_v29, %v2770_v14  ;;  %v1135_v35 = vmul.f32 7.5, %v1127_v30  ;;  %v1142_v40 = vadd.f32 %v2762_v6, %v1134_v34  ;;  %v2772_v12 = vpop.eup %2771  ;;  %v1250_v6 = vmul.f32 %v1241_v15, %v3221_v47  ;;  %v3442_v21 = vld [vmem:[%s3740_s7] sm:$0xff]  ;;  %v3450_v30 = vld [vmem:[%s3740_s7 + $0x8] sm:$0xff] }
 0x6d8   :  { %2592 = vmatpush1.bf16.msra.mxu0 %v2591_v17  ;;  %v1251_v11 = vmul.f32 %v1248_v59, %v3226_v50 }
 0x6d9   :  { %v1136_v37 = vmul.f32 7.5, %v1128_v33  ;;  %v1143_v39 = vadd.f32 %v2766_v20, %v1135_v35 }
 0x6db   :  { %v1144_v16 = vadd.f32 %v2770_v14, %v1136_v37  ;;  %v2595_v41 = vpack.c.bf16 %v1143_v39, %v1141_v38  ;;  %v3466_v14 = vld [vmem:[%s3740_s7 + $0x18] sm:$0xff] }
 0x6dd   :  { %v2593_v42 = vpack.c.bf16 %v1144_v16, %v1142_v40 }
 0x6df   :  { %2594 = vmatprep.subr.bf16.mxu0 %v2593_v42 }
 0x6e0   :  { %2596 = vmatpush1.bf16.msra.mxu0 %v2595_v41 }
 0x6e3   :  { %2502 = vmatmul.mubr.msk.f32.vlgmr.msra.gmra.mrb[18].mxu0 %vm308_vm2, %v3193_v1 }
 0x6e4   :  { %1334 = vmatprep.mubr.f32.mxu0 %v2977_v2 }
 0x7b6   :  { %v1211_v43 = vpop.f32.mrb[18].mxu0 }
 0x7b7   :  { %v1212_v0 = vadd.f32 %v1211_v43, %v3198_v5  ;;  %v1213_v44 = vpop.f32.mrb[19].mxu0 }
 0x7b8   :  { %v1214_v46 = vadd.f32 %v1213_v44, %v3198_v5 }
 0x7b9   :  { %v1217_v58 = vmul.f32 %v1212_v0, %v3344_v7  ;;  %v1232_v1 = vmul.f32 %v3409_v8, %v1212_v0 }
 0x7ba   :  { %v1218_v4 = vmul.f32 %v1214_v46, %v3344_v7  ;;  %v1233_v55 = vmul.f32 %v3409_v8, %v1214_v46 }
 0x7bc   :  { %v1221_v56 = vcombine.low %v1217_v58, %v1218_v4  ;;  %v1236_v62 = vcombine.low %v1232_v1, %v1233_v55 }
 0x7be   :  { %v1223_v57 = vsub.f32 %v3364_v48, %v1221_v56 }
 0x7c0   :  { %v1226_v7 = vmul.f32 %v2772_v12, %v1223_v57 }
 0x7c2   :  { %v2503_v61 = vclamps-f32 %v1226_v7, 1.0 }
 0x7c4   :  { %v1230_v63 = vmul.f32 %v2503_v61, %v3414_v54 }
 0x7c6   :  { %v1238_v13 = vadd.f32 %v1236_v62, %v1230_v63 }
 0x7c8   :  { %v1243_v3 = vcombine.high %v1238_v13, %v1238_v13  ;;  %v1245_v10 = vmul.f32 %v1238_v13, %v3224_v49 }
 0x7ca   :  { %v1246_v17 = vmul.f32 %v1243_v3, %v3228_v53  ;;  %v1252_v19 = vadd.f32 %v1250_v6, %v1245_v10 }
 0x7cc   :  { %v1253_v20 = vadd.f32 %v1251_v11, %v1246_v17 }
 0x7ce   :  { %v3434_v29 = vcombine.low %v1252_v19, %v1253_v20  ;;  %v2560_v48 = vcombine.low %v1253_v20, %v1253_v20 }
 0x7d0   :  { %2508 = vmatprep.subr.msk.mxu0 %vm113_vm0, %v2560_v48 }
 0x7d1   :  { %2509 = vmatpush1.msk.msra.mxu0 %vm113_vm0, %v3434_v29 }
 0x7d2   :  { %2510 = vmatmul.mubr.msk.f32.vlgmr.msra.gmra.mrb[20].mxu0 %vm100_vm1, %v3442_v21 }
 0x7d3   :  { %1340 = vmatprep.mubr.f32.mxu0 %v2977_v2 }
 0x7d6   :  { %2511 = vmatmul.mubr.msk.f32.gmra.mrb[22].mxu0 %vm100_vm1, %v3450_v30 }
 0x7d7   :  { %1346 = vmatprep.mubr.f32.mxu0 %v2977_v2 }
 0x7da   :  { %2512 = vmatmul.mubr.msk.f32.gmra.mrb[24].mxu0 %vm100_vm1, %v3458_v31 }
 0x7db   :  { %1352 = vmatprep.mubr.f32.mxu0 %v2977_v2 }
 0x7de   :  { %2513 = vmatmul.mubr.msk.f32.gmra.mrb[26].mxu0 %vm100_vm1, %v3466_v14 }
 0x7df   :  { %1749 = vmatprep.mubr.f32.mxu0 %v2977_v2 }
 0x8a5   :  { %v1336_v33 = vpop.f32.mrb[20].mxu0 }
 0x8a6   :  { %v1337_v34 = vadd.f32 %v1336_v33, %v3142_v22  ;;  %v1338_v35 = vpop.f32.mrb[21].mxu0 }
 0x8a7   :  { %v1339_v37 = vadd.f32 %v1338_v35, %v3142_v22 }
 0x8a8   :  { %v1359_v38 = vadd.f32 %v1337_v34, %v3144_v23  ;;  %v1375_v39 = vadd.f32 %v1337_v34, %v3150_v26 }
 0x8a9   :  { %v1360_v40 = vadd.f32 %v1339_v37, %v3144_v23  ;;  %v1376_v16 = vadd.f32 %v1339_v37, %v3150_v26  ;;  %v1342_v41 = vpop.f32.mrb[22].mxu0 }
 0x8aa   :  { %2773 = vtanh.f32 %v1359_v38  ;;  %v1343_v42 = vadd.f32 %v1342_v41, %v3146_v24  ;;  %v1344_v43 = vpop.f32.mrb[23].mxu0 }
 0x8ab   :  { %2775 = vtanh.f32 %v1375_v39  ;;  %v1345_v0 = vadd.f32 %v1344_v43, %v3146_v24 }
 0x8ac   :  { %2777 = vtanh.f32 %v1360_v40  ;;  %v1361_v44 = vadd.f32 %v1343_v42, %v3148_v25  ;;  %v1377_v46 = vadd.f32 %v1343_v42, %v3152_v27 }
 0x8ad   :  { %2779 = vtanh.f32 %v1376_v16  ;;  %v1362_v58 = vadd.f32 %v1345_v0, %v3148_v25  ;;  %v1378_v1 = vadd.f32 %v1345_v0, %v3152_v27  ;;  %v1348_v4 = vpop.f32.mrb[24].mxu0 }
 0x8ae   :  { %2781 = vtanh.f32 %v1361_v44  ;;  %v1349_v55 = vadd.f32 %v1348_v4, %v3154_v28  ;;  %v1350_v18 = vpop.f32.mrb[25].mxu0 }
 0x8af   :  { %2783 = vtanh.f32 %v1377_v46  ;;  %v1351_v9 = vadd.f32 %v1350_v18, %v3154_v28 }
 0x8b0   :  { %2785 = vtanh.f32 %v1362_v58  ;;  %v1363_v56 = vadd.f32 %v1349_v55, %v3162_v36  ;;  %v1379_v62 = vadd.f32 %v1349_v55, %v3175_v51 }
 0x8b1   :  { %2787 = vtanh.f32 %v1378_v1  ;;  %v1364_v12 = vadd.f32 %v1351_v9, %v3162_v36  ;;  %v1380_v57 = vadd.f32 %v1351_v9, %v3175_v51  ;;  %v1354_v15 = vpop.f32.mrb[26].mxu0 }
 0x8b2   :  { %2789 = vtanh.f32 %v1363_v56  ;;  %v1355_v7 = vadd.f32 %v1354_v15, %v3157_v32  ;;  %v1356_v61 = vpop.f32.mrb[27].mxu0 }
 0x8b3   :  { %2791 = vtanh.f32 %v1379_v62  ;;  %v1357_v59 = vadd.f32 %v1356_v61, %v3157_v32 }
 0x8b4   :  { %v2774_v63 = vpop.eup %2773  ;;  %2793 = vtanh.f32 %v1364_v12  ;;  %v1365_v13 = vadd.f32 %v1355_v7, %v3170_v45  ;;  %v1381_v6 = vadd.f32 %v1355_v7, %v3183_v60 }
 0x8b5   :  { %v2776_v3 = vpop.eup %2775  ;;  %2795 = vtanh.f32 %v1380_v57  ;;  %v1366_v10 = vadd.f32 %v1357_v59, %v3170_v45  ;;  %v1382_v11 = vadd.f32 %v1357_v59, %v3183_v60 }
 0x8b6   :  { %v2778_v17 = vpop.eup %2777  ;;  %2797 = vtanh.f32 %v1365_v13  ;;  %v1391_v19 = vsub.f32 %v2774_v63, %v2776_v3 }
 0x8b7   :  { %v2780_v20 = vpop.eup %2779  ;;  %2799 = vtanh.f32 %v1381_v6 }
 0x8b8   :  { %v2782_v48 = vpop.eup %2781  ;;  %2801 = vtanh.f32 %v1366_v10  ;;  %v1392_v33 = vsub.f32 %v2778_v17, %v2780_v20  ;;  %v1399_v38 = vmul.f32 7.5, %v1391_v19 }
 0x8b9   :  { %v2784_v34 = vpop.eup %2783  ;;  %2803 = vtanh.f32 %v1382_v11 }
 0x8ba   :  { %v2786_v35 = vpop.eup %2785  ;;  %v1393_v37 = vsub.f32 %v2782_v48, %v2784_v34  ;;  %v1400_v41 = vmul.f32 7.5, %v1392_v33  ;;  %v1407_v46 = vadd.f32 %v2776_v3, %v1399_v38  ;;  %v3498_v33 = vld [vmem:[%s3742_s9] sm:$0xf]  ;;  %2805 = vrcp.f32 %v3414_v54 }
 0x8bb   :  { %v2788_v39 = vpop.eup %2787  ;;  %v3517_v54 = vld [vmem:[%s3735_s2] sm:$0xff]  ;;  %s2519_s2 = sld [smem:[#allocation5 + $0x6]] }
 0x8bc   :  { %v2790_v40 = vpop.eup %2789  ;;  %v1394_v16 = vsub.f32 %v2786_v35, %v2788_v39  ;;  %v1401_v42 = vmul.f32 7.5, %v1393_v37  ;;  %v1408_v18 = vadd.f32 %v2780_v20, %v1400_v41  ;;  %v3504_v35 = vstv %s2507_s12 }
 0x8bd   :  { %v2792_v43 = vpop.eup %2791 }
 0x8be   :  { %v2794_v0 = vpop.eup %2793  ;;  %v1402_v44 = vmul.f32 7.5, %v1394_v16  ;;  %v1409_v58 = vadd.f32 %v2784_v34, %v1401_v42  ;;  %v1395_v1 = vsub.f32 %v2790_v40, %v2792_v43  ;;  %v3509_v16 = vstv %s2506_s16 }
 0x8bf   :  { %v2796_v4 = vpop.eup %2795 }
 0x8c0   :  { %v2798_v55 = vpop.eup %2797  ;;  %v1410_v9 = vadd.f32 %v2788_v39, %v1402_v44  ;;  %v2599_v56 = vpack.c.bf16 %v1409_v58, %v1407_v46  ;;  %v1396_v62 = vsub.f32 %v2794_v0, %v2796_v4  ;;  %v1403_v61 = vmul.f32 7.5, %v1395_v1 }
 0x8c1   :  { %v2800_v12 = vpop.eup %2799  ;;  %v1509_v0 = vmul.f32 %v3517_v54, %v3509_v16  ;;  %v1510_v44 = vmul.f32 %v3424_v52, %v3504_v35 }
 0x8c2   :  { %v2802_v57 = vpop.eup %2801  ;;  %v2597_v15 = vpack.c.bf16 %v1410_v9, %v1408_v18  ;;  %v1397_v7 = vsub.f32 %v2798_v55, %v2800_v12  ;;  %v1404_v13 = vmul.f32 7.5, %v1396_v62  ;;  %v1411_v10 = vadd.f32 %v2792_v43, %v1403_v61 }
 0x8c3   :  { %v2804_v59 = vpop.eup %2803  ;;  %v1511_v55 = vadd.f32 %v1510_v44, %v1509_v0 }
 0x8c4   :  { %2598 = vmatprep.subr.bf16.mxu1 %v2597_v15  ;;  %v1398_v63 = vsub.f32 %v2802_v57, %v2804_v59  ;;  %v1405_v6 = vmul.f32 7.5, %v1397_v7  ;;  %v1412_v17 = vadd.f32 %v2796_v4, %v1404_v13  ;;  %v2806_v1 = vpop.eup %2805 }
 0x8c5   :  { %2600 = vmatpush1.bf16.msra.mxu1 %v2599_v56  ;;  %v1518_v9 = vcombine.high %v1511_v55, %v1511_v55 }
 0x8c6   :  { %v1406_v3 = vmul.f32 7.5, %v1398_v63  ;;  %v1413_v11 = vadd.f32 %v2800_v12, %v1405_v6  ;;  %v1520_v12 = vmul.f32 %v1511_v55, %v3221_v47 }
 0x8c7   :  { %v1521_v7 = vmul.f32 %v1518_v9, %v3226_v50 }
 0x8c8   :  { %v1414_v19 = vadd.f32 %v2804_v59, %v1406_v3  ;;  %v2603_v20 = vpack.c.bf16 %v1413_v11, %v1411_v10 }
 0x8ca   :  { %v2601_v48 = vpack.c.bf16 %v1414_v19, %v1412_v17 }
 0x8cc   :  { %2602 = vmatprep.subr.bf16.mxu1 %v2601_v48 }
 0x8cd   :  { %2604 = vmatpush1.bf16.msra.mxu1 %v2603_v20 }
 0x8d0   :  { %2514 = vmatmul.mubr.msk.f32.vlgmr.msra.gmra.mrb[20].mxu1 %vm308_vm2, %v3498_v33 }
 0x8d1   :  { %1604 = vmatprep.mubr.f32.mxu1 %v2977_v2 }
 0x9a3   :  { %v1481_v34 = vpop.f32.mrb[20].mxu1 }
 0x9a4   :  { %v1482_v37 = vadd.f32 %v1481_v34, %v3198_v5  ;;  %v1483_v38 = vpop.f32.mrb[21].mxu1 }
 0x9a5   :  { %v1484_v39 = vadd.f32 %v1483_v38, %v3198_v5 }
 0x9a6   :  { %v1487_v40 = vmul.f32 %v1482_v37, %v3409_v8  ;;  %v1502_v41 = vmul.f32 %v3504_v35, %v1482_v37 }
 0x9a7   :  { %v1488_v42 = vmul.f32 %v1484_v39, %v3409_v8  ;;  %v1503_v43 = vmul.f32 %v3504_v35, %v1484_v39 }
 0x9a9   :  { %v1491_v46 = vcombine.low %v1487_v40, %v1488_v42  ;;  %v1506_v58 = vcombine.low %v1502_v41, %v1503_v43 }
 0x9ab   :  { %v1493_v4 = vsub.f32 %v3434_v29, %v1491_v46 }
 0x9ad   :  { %v1496_v8 = vmul.f32 %v2806_v1, %v1493_v4 }
 0x9af   :  { %v2515_v18 = vclamps-f32 %v1496_v8, 1.0 }
 0x9b1   :  { %v1500_v56 = vmul.f32 %v2515_v18, %v3509_v16 }
 0x9b3   :  { %v1508_v62 = vadd.f32 %v1506_v58, %v1500_v56 }
 0x9b5   :  { %v1513_v57 = vcombine.high %v1508_v62, %v1508_v62  ;;  %v1515_v15 = vmul.f32 %v1508_v62, %v3224_v49 }
 0x9b7   :  { %v1516_v61 = vmul.f32 %v1513_v57, %v3228_v53  ;;  %v1522_v59 = vadd.f32 %v1520_v12, %v1515_v15 }
 0x9b9   :  { %v1523_v63 = vadd.f32 %v1521_v7, %v1516_v61 }
 0x9bb   :  { %v3529_v13 = vcombine.low %v1522_v59, %v1523_v63  ;;  %v2561_v29 = vcombine.low %v1523_v63, %v1523_v63 }
 0x9bd   :  { %2520 = vmatprep.subr.msk.mxu1 %vm113_vm0, %v2561_v29 }
 0x9be   :  { %2521 = vmatpush1.msk.msra.mxu1 %vm113_vm0, %v3529_v13 }
 0x9bf   :  { %2522 = vmatmul.mubr.msk.f32.vlgmr.msra.gmra.mrb[22].mxu1 %vm100_vm1, %v3442_v21 }
 0x9c0   :  { %1610 = vmatprep.mubr.f32.mxu1 %v2977_v2 }
 0x9c3   :  { %2523 = vmatmul.mubr.msk.f32.gmra.mrb[24].mxu1 %vm100_vm1, %v3450_v30 }
 0x9c4   :  { %1616 = vmatprep.mubr.f32.mxu1 %v2977_v2 }
 0x9c7   :  { %2524 = vmatmul.mubr.msk.f32.gmra.mrb[26].mxu1 %vm100_vm1, %v3458_v31 }
 0x9c8   :  { %1622 = vmatprep.mubr.f32.mxu1 %v2977_v2 }
 0x9cb   :  { %2525 = vmatmul.mubr.msk.f32.gmra.mrb[28].mxu1 %vm100_vm1, %v3466_v14 }
 0x9cc   :  { %2019 = vmatprep.mubr.f32.mxu1 %v2977_v2 }
 0xa92   :  { %v1606_v6 = vpop.f32.mrb[22].mxu1 }
 0xa93   :  { %v1607_v3 = vadd.f32 %v1606_v6, %v3142_v22  ;;  %v1608_v10 = vpop.f32.mrb[23].mxu1 }
 0xa94   :  { %v1609_v11 = vadd.f32 %v1608_v10, %v3142_v22 }
 0xa95   :  { %v1629_v17 = vadd.f32 %v1607_v3, %v3144_v23  ;;  %v1645_v19 = vadd.f32 %v1607_v3, %v3150_v26 }
 0xa96   :  { %v1630_v20 = vadd.f32 %v1609_v11, %v3144_v23  ;;  %v1646_v48 = vadd.f32 %v1609_v11, %v3150_v26  ;;  %v1612_v34 = vpop.f32.mrb[24].mxu1 }
 0xa97   :  { %2807 = vtanh.f32 %v1629_v17  ;;  %v1613_v37 = vadd.f32 %v1612_v34, %v3146_v24  ;;  %v1614_v38 = vpop.f32.mrb[25].mxu1 }
 0xa98   :  { %2809 = vtanh.f32 %v1645_v19  ;;  %v1615_v39 = vadd.f32 %v1614_v38, %v3146_v24 }
 0xa99   :  { %2811 = vtanh.f32 %v1630_v20  ;;  %v1631_v40 = vadd.f32 %v1613_v37, %v3148_v25  ;;  %v1647_v41 = vadd.f32 %v1613_v37, %v3152_v27 }
 0xa9a   :  { %2813 = vtanh.f32 %v1646_v48  ;;  %v1632_v42 = vadd.f32 %v1615_v39, %v3148_v25  ;;  %v1648_v43 = vadd.f32 %v1615_v39, %v3152_v27  ;;  %v1618_v0 = vpop.f32.mrb[26].mxu1 }
 0xa9b   :  { %2815 = vtanh.f32 %v1631_v40  ;;  %v1619_v44 = vadd.f32 %v1618_v0, %v3154_v28  ;;  %v1620_v46 = vpop.f32.mrb[27].mxu1 }
 0xa9c   :  { %2817 = vtanh.f32 %v1647_v41  ;;  %v1621_v58 = vadd.f32 %v1620_v46, %v3154_v28 }
 0xa9d   :  { %2819 = vtanh.f32 %v1632_v42  ;;  %v1633_v1 = vadd.f32 %v1619_v44, %v3162_v36  ;;  %v1649_v4 = vadd.f32 %v1619_v44, %v3175_v51 }
 0xa9e   :  { %2821 = vtanh.f32 %v1648_v43  ;;  %v1634_v55 = vadd.f32 %v1621_v58, %v3162_v36  ;;  %v1650_v8 = vadd.f32 %v1621_v58, %v3175_v51  ;;  %v1624_v18 = vpop.f32.mrb[28].mxu1 }
 0xa9f   :  { %2823 = vtanh.f32 %v1633_v1  ;;  %v1625_v9 = vadd.f32 %v1624_v18, %v3157_v32  ;;  %v1626_v56 = vpop.f32.mrb[29].mxu1 }
 0xaa0   :  { %2825 = vtanh.f32 %v1649_v4  ;;  %v1627_v62 = vadd.f32 %v1626_v56, %v3157_v32 }
 0xaa1   :  { %v2808_v12 = vpop.eup %2807  ;;  %2827 = vtanh.f32 %v1634_v55  ;;  %v1635_v57 = vadd.f32 %v1625_v9, %v3170_v45  ;;  %v1651_v15 = vadd.f32 %v1625_v9, %v3183_v60 }
 0xaa2   :  { %v2810_v7 = vpop.eup %2809  ;;  %2829 = vtanh.f32 %v1650_v8  ;;  %v1636_v61 = vadd.f32 %v1627_v62, %v3170_v45  ;;  %v1652_v59 = vadd.f32 %v1627_v62, %v3183_v60 }
 0xaa3   :  { %v2812_v63 = vpop.eup %2811  ;;  %2831 = vtanh.f32 %v1635_v57  ;;  %v1661_v29 = vsub.f32 %v2808_v12, %v2810_v7 }
 0xaa4   :  { %v2814_v6 = vpop.eup %2813  ;;  %2833 = vtanh.f32 %v1651_v15 }
 0xaa5   :  { %v2816_v3 = vpop.eup %2815  ;;  %2835 = vtanh.f32 %v1636_v61  ;;  %v1662_v10 = vsub.f32 %v2812_v63, %v2814_v6  ;;  %v1669_v20 = vmul.f32 7.5, %v1661_v29 }
 0xaa6   :  { %v2818_v11 = vpop.eup %2817  ;;  %2837 = vtanh.f32 %v1652_v59 }
 0xaa7   :  { %v2820_v17 = vpop.eup %2819  ;;  %v1663_v19 = vsub.f32 %v2816_v3, %v2818_v11  ;;  %v1670_v38 = vmul.f32 7.5, %v1662_v10  ;;  %v1677_v43 = vadd.f32 %v2810_v7, %v1669_v20  ;;  %2839 = vrcp.f32 %v3509_v16 }
 0xaa8   :  { %v2822_v48 = vpop.eup %2821 }
 0xaa9   :  { %v2824_v34 = vpop.eup %2823  ;;  %v1664_v37 = vsub.f32 %v2820_v17, %v2822_v48  ;;  %v1671_v39 = vmul.f32 7.5, %v1663_v19  ;;  %v1678_v1 = vadd.f32 %v2814_v6, %v1670_v38  ;;  %v3574_v19 = vstv %s2519_s2 }
 0xaaa   :  { %v2826_v40 = vpop.eup %2825  ;;  %v3579_v38 = vstv %s2518_s1 }
 0xaab   :  { %v2828_v41 = vpop.eup %2827  ;;  %v1672_v42 = vmul.f32 7.5, %v1664_v37  ;;  %v1679_v0 = vadd.f32 %v2818_v11, %v1671_v39  ;;  %v1665_v44 = vsub.f32 %v2824_v34, %v2826_v40  ;;  %v1779_v16 = vmul.f32 %v3517_v54, %v3579_v38 }
 0xaac   :  { %v2830_v46 = vpop.eup %2829 }
 0xaad   :  { %v2832_v58 = vpop.eup %2831  ;;  %v1680_v4 = vadd.f32 %v2822_v48, %v1672_v42  ;;  %v2607_v55 = vpack.c.bf16 %v1679_v0, %v1677_v43  ;;  %v1666_v8 = vsub.f32 %v2828_v41, %v2830_v46  ;;  %v1673_v12 = vmul.f32 7.5, %v1665_v44 }
 0xaae   :  { %v2834_v18 = vpop.eup %2833  ;;  %v1780_v42 = vmul.f32 %v3424_v52, %v3574_v19 }
 0xaaf   :  { %v2836_v9 = vpop.eup %2835  ;;  %v2605_v56 = vpack.c.bf16 %v1680_v4, %v1678_v1  ;;  %v1667_v62 = vsub.f32 %v2832_v58, %v2834_v18  ;;  %v1674_v61 = vmul.f32 7.5, %v1666_v8  ;;  %v1681_v63 = vadd.f32 %v2826_v40, %v1673_v12 }
 0xab0   :  { %v2838_v57 = vpop.eup %2837  ;;  %v1781_v58 = vadd.f32 %v1780_v42, %v1779_v16 }
 0xab1   :  { %2606 = vmatprep.subr.bf16.mxu0 %v2605_v56  ;;  %v1668_v15 = vsub.f32 %v2836_v9, %v2838_v57  ;;  %v1675_v59 = vmul.f32 7.5, %v1667_v62  ;;  %v1682_v3 = vadd.f32 %v2830_v46, %v1674_v61  ;;  %v2840_v44 = vpop.eup %2839 }
 0xab2   :  { %2608 = vmatpush1.bf16.msra.mxu0 %v2607_v55  ;;  %v1788_v55 = vcombine.high %v1781_v58, %v1781_v58 }
 0xab3   :  { %v1676_v7 = vmul.f32 7.5, %v1668_v15  ;;  %v1683_v29 = vadd.f32 %v2834_v18, %v1675_v59  ;;  %v1790_v18 = vmul.f32 %v1781_v58, %v3221_v47 }
 0xab4   :  { %v1791_v62 = vmul.f32 %v1788_v55, %v3226_v50 }
 0xab5   :  { %v1684_v10 = vadd.f32 %v2838_v57, %v1676_v7  ;;  %v2611_v6 = vpack.c.bf16 %v1683_v29, %v1681_v63 }
 0xab7   :  { %v2609_v11 = vpack.c.bf16 %v1684_v10, %v1682_v3 }
 0xab9   :  { %2610 = vmatprep.subr.bf16.mxu0 %v2609_v11 }
 0xaba   :  { %2612 = vmatpush1.bf16.msra.mxu0 %v2611_v6 }
 0xabd   :  { %2526 = vmatmul.mubr.msk.f32.vlgmr.msra.gmra.mrb[28].mxu0 %vm308_vm2, %v3498_v33 }
 0xabe   :  { %1874 = vmatprep.mubr.f32.mxu0 %v2977_v2 }
 0xb90   :  { %v1751_v17 = vpop.f32.mrb[28].mxu0 }
 0xb91   :  { %v1752_v20 = vadd.f32 %v1751_v17, %v3198_v5  ;;  %v1753_v48 = vpop.f32.mrb[29].mxu0 }
 0xb92   :  { %v1754_v34 = vadd.f32 %v1753_v48, %v3198_v5 }
 0xb93   :  { %v1757_v37 = vmul.f32 %v1752_v20, %v3504_v35  ;;  %v1772_v39 = vmul.f32 %v3574_v19, %v1752_v20 }
 0xb94   :  { %v1758_v40 = vmul.f32 %v1754_v34, %v3504_v35  ;;  %v1773_v41 = vmul.f32 %v3574_v19, %v1754_v34 }
 0xb96   :  { %v1761_v43 = vcombine.low %v1757_v37, %v1758_v40  ;;  %v1776_v0 = vcombine.low %v1772_v39, %v1773_v41 }
 0xb98   :  { %v1763_v46 = vsub.f32 %v3529_v13, %v1761_v43 }
 0xb9a   :  { %v1766_v1 = vmul.f32 %v2840_v44, %v1763_v46 }
 0xb9c   :  { %v2527_v4 = vclamps-f32 %v1766_v1, 1.0 }
 0xb9e   :  { %v1770_v8 = vmul.f32 %v2527_v4, %v3579_v38 }
 0xba0   :  { %v1778_v35 = vadd.f32 %v1776_v0, %v1770_v8 }
 0xba2   :  { %v1783_v9 = vcombine.high %v1778_v35, %v1778_v35  ;;  %v1785_v56 = vmul.f32 %v1778_v35, %v3224_v49 }
 0xba4   :  { %v1786_v12 = vmul.f32 %v1783_v9, %v3228_v53  ;;  %v1792_v57 = vadd.f32 %v1790_v18, %v1785_v56 }
 0xba6   :  { %v1793_v15 = vadd.f32 %v1791_v62, %v1786_v12 }
 0xba8   :  { %v3594_v61 = vcombine.low %v1792_v57, %v1793_v15  ;;  %v2562_v13 = vcombine.low %v1793_v15, %v1793_v15 }
 0xbaa   :  { %2532 = vmatprep.subr.msk.mxu0 %vm113_vm0, %v2562_v13 }
 0xbab   :  { %2533 = vmatpush1.msk.msra.mxu0 %vm113_vm0, %v3594_v61 }
 0xbac   :  { %2534 = vmatmul.mubr.msk.f32.vlgmr.msra.gmra.mrb[30].mxu0 %vm100_vm1, %v3442_v21 }
 0xbad   :  { %1880 = vmatprep.mubr.f32.mxu0 %v2977_v2 }
 0xbb0   :  { %2535 = vmatmul.mubr.msk.f32.gmra.mrb[32].mxu0 %vm100_vm1, %v3450_v30 }
 0xbb1   :  { %1886 = vmatprep.mubr.f32.mxu0 %v2977_v2 }
 0xbb4   :  { %2536 = vmatmul.mubr.msk.f32.gmra.mrb[34].mxu0 %vm100_vm1, %v3458_v31 }
 0xbb5   :  { %1892 = vmatprep.mubr.f32.mxu0 %v2977_v2 }
 0xbb8   :  { %2537 = vmatmul.mubr.msk.f32.gmra.mrb[36].mxu0 %vm100_vm1, %v3466_v14 }
 0xbb9   :  { %2289 = vmatprep.mubr.f32.mxu0 %v2977_v2 }
 0xc7f   :  { %v1876_v59 = vpop.f32.mrb[30].mxu0 }
 0xc80   :  { %v1877_v7 = vadd.f32 %v1876_v59, %v3142_v22  ;;  %v1878_v63 = vpop.f32.mrb[31].mxu0 }
 0xc81   :  { %v1879_v29 = vadd.f32 %v1878_v63, %v3142_v22 }
 0xc82   :  { %v1899_v3 = vadd.f32 %v1877_v7, %v3144_v23  ;;  %v1915_v10 = vadd.f32 %v1877_v7, %v3150_v26 }
 0xc83   :  { %v1900_v6 = vadd.f32 %v1879_v29, %v3144_v23  ;;  %v1916_v11 = vadd.f32 %v1879_v29, %v3150_v26  ;;  %v1882_v17 = vpop.f32.mrb[32].mxu0 }
 0xc84   :  { %2841 = vtanh.f32 %v1899_v3  ;;  %v1883_v20 = vadd.f32 %v1882_v17, %v3146_v24  ;;  %v1884_v48 = vpop.f32.mrb[33].mxu0 }
 0xc85   :  { %2843 = vtanh.f32 %v1915_v10  ;;  %v1885_v34 = vadd.f32 %v1884_v48, %v3146_v24 }
 0xc86   :  { %2845 = vtanh.f32 %v1900_v6  ;;  %v1901_v37 = vadd.f32 %v1883_v20, %v3148_v25  ;;  %v1917_v39 = vadd.f32 %v1883_v20, %v3152_v27 }
 0xc87   :  { %2847 = vtanh.f32 %v1916_v11  ;;  %v1902_v40 = vadd.f32 %v1885_v34, %v3148_v25  ;;  %v1918_v41 = vadd.f32 %v1885_v34, %v3152_v27  ;;  %v1888_v16 = vpop.f32.mrb[34].mxu0 }
 0xc88   :  { %2849 = vtanh.f32 %v1901_v37  ;;  %v1889_v42 = vadd.f32 %v1888_v16, %v3154_v28  ;;  %v1890_v43 = vpop.f32.mrb[35].mxu0 }
 0xc89   :  { %2851 = vtanh.f32 %v1917_v39  ;;  %v1891_v0 = vadd.f32 %v1890_v43, %v3154_v28 }
 0xc8a   :  { %2853 = vtanh.f32 %v1902_v40  ;;  %v1903_v44 = vadd.f32 %v1889_v42, %v3162_v36  ;;  %v1919_v46 = vadd.f32 %v1889_v42, %v3175_v51 }
 0xc8b   :  { %2855 = vtanh.f32 %v1918_v41  ;;  %v1904_v58 = vadd.f32 %v1891_v0, %v3162_v36  ;;  %v1920_v1 = vadd.f32 %v1891_v0, %v3175_v51  ;;  %v1894_v4 = vpop.f32.mrb[36].mxu0 }
 0xc8c   :  { %2857 = vtanh.f32 %v1903_v44  ;;  %v1895_v55 = vadd.f32 %v1894_v4, %v3157_v32  ;;  %v1896_v8 = vpop.f32.mrb[37].mxu0 }
 0xc8d   :  { %2859 = vtanh.f32 %v1919_v46  ;;  %v1897_v35 = vadd.f32 %v1896_v8, %v3157_v32 }
 0xc8e   :  { %v2842_v18 = vpop.eup %2841  ;;  %2861 = vtanh.f32 %v1904_v58  ;;  %v1905_v9 = vadd.f32 %v1895_v55, %v3170_v45  ;;  %v1921_v56 = vadd.f32 %v1895_v55, %v3183_v60 }
 0xc8f   :  { %v2844_v62 = vpop.eup %2843  ;;  %2863 = vtanh.f32 %v1920_v1  ;;  %v1906_v12 = vadd.f32 %v1897_v35, %v3170_v45  ;;  %v1922_v57 = vadd.f32 %v1897_v35, %v3183_v60 }
 0xc90   :  { %v2846_v15 = vpop.eup %2845  ;;  %2865 = vtanh.f32 %v1905_v9  ;;  %v1931_v13 = vsub.f32 %v2842_v18, %v2844_v62 }
 0xc91   :  { %v2848_v59 = vpop.eup %2847  ;;  %2867 = vtanh.f32 %v1921_v56 }
 0xc92   :  { %v2850_v7 = vpop.eup %2849  ;;  %2869 = vtanh.f32 %v1906_v12  ;;  %v1932_v63 = vsub.f32 %v2846_v15, %v2848_v59  ;;  %v1939_v6 = vmul.f32 7.5, %v1931_v13 }
 0xc93   :  { %v2852_v29 = vpop.eup %2851  ;;  %2871 = vtanh.f32 %v1922_v57 }
 0xc94   :  { %v2854_v3 = vpop.eup %2853  ;;  %v1933_v10 = vsub.f32 %v2850_v7, %v2852_v29  ;;  %v1940_v48 = vmul.f32 7.5, %v1932_v63  ;;  %v1947_v41 = vadd.f32 %v2844_v62, %v1939_v6  ;;  %2873 = vrcp.f32 %v3579_v38 }
 0xc95   :  { %v2856_v11 = vpop.eup %2855 }
 0xc96   :  { %v2858_v17 = vpop.eup %2857  ;;  %v1934_v20 = vsub.f32 %v2854_v3, %v2856_v11  ;;  %v1941_v34 = vmul.f32 7.5, %v1933_v10  ;;  %v1948_v44 = vadd.f32 %v2848_v59, %v1940_v48  ;;  %v3639_v10 = vstv %s2531_s17 }
 0xc97   :  { %v2860_v37 = vpop.eup %2859  ;;  %v3644_v48 = vstv %s2530_s18 }
 0xc98   :  { %v2862_v39 = vpop.eup %2861  ;;  %v1942_v40 = vmul.f32 7.5, %v1934_v20  ;;  %v1949_v16 = vadd.f32 %v2852_v29, %v1941_v34  ;;  %v1935_v42 = vsub.f32 %v2858_v17, %v2860_v37  ;;  %v2049_v38 = vmul.f32 %v3517_v54, %v3644_v48 }
 0xc99   :  { %v2864_v43 = vpop.eup %2863 }
 0xc9a   :  { %v2866_v0 = vpop.eup %2865  ;;  %v1950_v46 = vadd.f32 %v2856_v11, %v1942_v40  ;;  %v2615_v58 = vpack.c.bf16 %v1949_v16, %v1947_v41  ;;  %v1936_v1 = vsub.f32 %v2862_v39, %v2864_v43  ;;  %v1943_v18 = vmul.f32 7.5, %v1935_v42 }
 0xc9b   :  { %v2868_v4 = vpop.eup %2867  ;;  %v2050_v40 = vmul.f32 %v3424_v52, %v3639_v10 }
 0xc9c   :  { %v2870_v55 = vpop.eup %2869  ;;  %v2613_v8 = vpack.c.bf16 %v1950_v46, %v1948_v44  ;;  %v1937_v35 = vsub.f32 %v2866_v0, %v2868_v4  ;;  %v1944_v12 = vmul.f32 7.5, %v1936_v1  ;;  %v1951_v15 = vadd.f32 %v2860_v37, %v1943_v18 }
 0xc9d   :  { %v2872_v9 = vpop.eup %2871  ;;  %v2051_v0 = vadd.f32 %v2050_v40, %v2049_v38 }
 0xc9e   :  { %2614 = vmatprep.subr.bf16.mxu1 %v2613_v8  ;;  %v1938_v56 = vsub.f32 %v2870_v55, %v2872_v9  ;;  %v1945_v57 = vmul.f32 7.5, %v1937_v35  ;;  %v1952_v7 = vadd.f32 %v2864_v43, %v1944_v12  ;;  %v2874_v42 = vpop.eup %2873 }
 0xc9f   :  { %2616 = vmatpush1.bf16.msra.mxu1 %v2615_v58  ;;  %v2058_v58 = vcombine.high %v2051_v0, %v2051_v0 }
 0xca0   :  { %v1946_v62 = vmul.f32 7.5, %v1938_v56  ;;  %v1953_v13 = vadd.f32 %v2868_v4, %v1945_v57  ;;  %v2060_v4 = vmul.f32 %v2051_v0, %v3221_v47 }
 0xca1   :  { %v2061_v35 = vmul.f32 %v2058_v58, %v3226_v50 }
 0xca2   :  { %v1954_v63 = vadd.f32 %v2872_v9, %v1946_v62  ;;  %v2619_v59 = vpack.c.bf16 %v1953_v13, %v1951_v15 }
 0xca4   :  { %v2617_v29 = vpack.c.bf16 %v1954_v63, %v1952_v7 }
 0xca6   :  { %2618 = vmatprep.subr.bf16.mxu1 %v2617_v29 }
 0xca7   :  { %2620 = vmatpush1.bf16.msra.mxu1 %v2619_v59 }
 0xcaa   :  { %2538 = vmatmul.mubr.msk.f32.vlgmr.msra.gmra.mrb[30].mxu1 %vm308_vm2, %v3498_v33 }
 0xcab   :  { %2144 = vmatprep.mubr.f32.mxu1 %v2977_v2 }
 0xd7d   :  { %v2021_v3 = vpop.f32.mrb[30].mxu1 }
 0xd7e   :  { %v2022_v6 = vadd.f32 %v2021_v3, %v3198_v5  ;;  %v2023_v11 = vpop.f32.mrb[31].mxu1 }
 0xd7f   :  { %v2024_v17 = vadd.f32 %v2023_v11, %v3198_v5 }
 0xd80   :  { %v2027_v20 = vmul.f32 %v2022_v6, %v3574_v19  ;;  %v2042_v34 = vmul.f32 %v3639_v10, %v2022_v6 }
 0xd81   :  { %v2028_v37 = vmul.f32 %v2024_v17, %v3574_v19  ;;  %v2043_v39 = vmul.f32 %v3639_v10, %v2024_v17 }
 0xd83   :  { %v2031_v41 = vcombine.low %v2027_v20, %v2028_v37  ;;  %v2046_v16 = vcombine.low %v2042_v34, %v2043_v39 }
 0xd85   :  { %v2033_v43 = vsub.f32 %v3594_v61, %v2031_v41 }
 0xd87   :  { %v2036_v44 = vmul.f32 %v2874_v42, %v2033_v43 }
 0xd89   :  { %v2539_v46 = vclamps-f32 %v2036_v44, 1.0 }
 0xd8b   :  { %v2040_v1 = vmul.f32 %v2539_v46, %v3644_v48 }
 0xd8d   :  { %v2048_v19 = vadd.f32 %v2046_v16, %v2040_v1 }
 0xd8f   :  { %v2053_v55 = vcombine.high %v2048_v19, %v2048_v19  ;;  %v2055_v8 = vmul.f32 %v2048_v19, %v3224_v49 }
 0xd91   :  { %v2056_v52 = vmul.f32 %v2053_v55, %v3228_v53  ;;  %v2062_v18 = vadd.f32 %v2060_v4, %v2055_v8 }
 0xd93   :  { %v2063_v9 = vadd.f32 %v2061_v35, %v2056_v52 }
 0xd95   :  { %v3659_v56 = vcombine.low %v2062_v18, %v2063_v9  ;;  %v2563_v61 = vcombine.low %v2063_v9, %v2063_v9 }
 0xd97   :  { %2544 = vmatprep.subr.msk.mxu1 %vm113_vm0, %v2563_v61 }
 0xd98   :  { %2545 = vmatpush1.msk.msra.mxu1 %vm113_vm0, %v3659_v56 }
 0xd99   :  { %2546 = vmatmul.mubr.msk.f32.vlgmr.msra.gmra.mrb[32].mxu1 %vm100_vm1, %v3442_v21 }
 0xd9a   :  { %2150 = vmatprep.mubr.f32.mxu1 %v2977_v2 }
 0xd9d   :  { %2547 = vmatmul.mubr.msk.f32.gmra.mrb[34].mxu1 %vm100_vm1, %v3450_v30 }
 0xd9e   :  { %2156 = vmatprep.mubr.f32.mxu1 %v2977_v2 }
 0xda1   :  { %2548 = vmatmul.mubr.msk.f32.gmra.mrb[36].mxu1 %vm100_vm1, %v3458_v31 }
 0xda2   :  { %2162 = vmatprep.mubr.f32.mxu1 %v2977_v2 }
 0xda5   :  { %2549 = vmatmul.mubr.msk.f32.gmra.mrb[38].mxu1 %vm100_vm1, %v3466_v14 }
 0xe6c   :  { %v2146_v12 = vpop.f32.mrb[32].mxu1 }
 0xe6d   :  { %v2147_v57 = vadd.f32 %v2146_v12, %v3142_v22  ;;  %v2148_v62 = vpop.f32.mrb[33].mxu1 }
 0xe6e   :  { %v2149_v21 = vadd.f32 %v2148_v62, %v3142_v22 }
 0xe6f   :  { %v2169_v15 = vadd.f32 %v2147_v57, %v3144_v23  ;;  %v2185_v30 = vadd.f32 %v2147_v57, %v3150_v26 }
 0xe70   :  { %v2170_v13 = vadd.f32 %v2149_v21, %v3144_v23  ;;  %v2186_v7 = vadd.f32 %v2149_v21, %v3150_v26  ;;  %v2152_v31 = vpop.f32.mrb[34].mxu1 }
 0xe71   :  { %2875 = vtanh.f32 %v2169_v15  ;;  %v2153_v63 = vadd.f32 %v2152_v31, %v3146_v24  ;;  %v2154_v59 = vpop.f32.mrb[35].mxu1 }
 0xe72   :  { %2877 = vtanh.f32 %v2185_v30  ;;  %v2155_v14 = vadd.f32 %v2154_v59, %v3146_v24 }
 0xe73   :  { %2879 = vtanh.f32 %v2170_v13  ;;  %v2171_v29 = vadd.f32 %v2153_v63, %v3148_v25  ;;  %v2187_v22 = vadd.f32 %v2153_v63, %v3152_v27 }
 0xe74   :  { %2881 = vtanh.f32 %v2186_v7  ;;  %v2172_v3 = vadd.f32 %v2155_v14, %v3148_v25  ;;  %v2188_v23 = vadd.f32 %v2155_v14, %v3152_v27  ;;  %v2158_v6 = vpop.f32.mrb[36].mxu1 }
 0xe75   :  { %2883 = vtanh.f32 %v2171_v29  ;;  %v2159_v26 = vadd.f32 %v2158_v6, %v3154_v28  ;;  %v2160_v11 = vpop.f32.mrb[37].mxu1 }
 0xe76   :  { %2885 = vtanh.f32 %v2187_v22  ;;  %v2161_v17 = vadd.f32 %v2160_v11, %v3154_v28 }
 0xe77   :  { %2887 = vtanh.f32 %v2172_v3  ;;  %v2173_v24 = vadd.f32 %v2159_v26, %v3162_v36  ;;  %v2189_v20 = vadd.f32 %v2159_v26, %v3175_v51 }
 0xe78   :  { %2889 = vtanh.f32 %v2188_v23  ;;  %v2174_v34 = vadd.f32 %v2161_v17, %v3162_v36  ;;  %v2190_v25 = vadd.f32 %v2161_v17, %v3175_v51  ;;  %v2164_v37 = vpop.f32.mrb[38].mxu1 }
 0xe79   :  { %2891 = vtanh.f32 %v2173_v24  ;;  %v2165_v27 = vadd.f32 %v2164_v37, %v3157_v32  ;;  %v2166_v39 = vpop.f32.mrb[39].mxu1  ;;  %v2311_v37 = vstv %s2543_s19 }
 0xe7a   :  { %2893 = vtanh.f32 %v2189_v20  ;;  %v2167_v38 = vadd.f32 %v2166_v39, %v3157_v32 }
 0xe7b   :  { %v2876_v40 = vpop.eup %2875  ;;  %2895 = vtanh.f32 %v2174_v34  ;;  %v2175_v28 = vadd.f32 %v2165_v27, %v3170_v45  ;;  %v2191_v41 = vadd.f32 %v2165_v27, %v3183_v60 }
 0xe7c   :  { %v2878_v16 = vpop.eup %2877  ;;  %2897 = vtanh.f32 %v2190_v25  ;;  %v2176_v36 = vadd.f32 %v2167_v38, %v3170_v45  ;;  %v2192_v51 = vadd.f32 %v2167_v38, %v3183_v60 }
 0xe7d   :  { %v2880_v42 = vpop.eup %2879  ;;  %2899 = vtanh.f32 %v2175_v28  ;;  %v2201_v43 = vsub.f32 %v2876_v40, %v2878_v16  ;;  %v2309_v28 = vstv %s2542_s20 }
 0xe7e   :  { %v2882_v0 = vpop.eup %2881  ;;  %2901 = vtanh.f32 %v2191_v41 }
 0xe7f   :  { %v2884_v44 = vpop.eup %2883  ;;  %2903 = vtanh.f32 %v2176_v36  ;;  %v2202_v32 = vsub.f32 %v2880_v42, %v2882_v0  ;;  %v2209_v19 = vmul.f32 7.5, %v2201_v43 }
 0xe80   :  { %v2886_v46 = vpop.eup %2885  ;;  %2905 = vtanh.f32 %v2192_v51 }
 0xe81   :  { %v2888_v58 = vpop.eup %2887  ;;  %v2203_v1 = vsub.f32 %v2884_v44, %v2886_v46  ;;  %v2210_v35 = vmul.f32 7.5, %v2202_v32  ;;  %v2217_v9 = vadd.f32 %v2878_v16, %v2209_v19  ;;  %2907 = vrcp.f32 %v3644_v48  ;;  %v2924_v48 = vld [vmem:[%s3736_s3] sm:$0xff] }
 0xe82   :  { %v2890_v4 = vpop.eup %2889  ;;  %v2320_v36 = vmul.f32 %v2924_v48, %v2311_v37 }
 0xe83   :  { %v2892_v55 = vpop.eup %2891  ;;  %v2204_v8 = vsub.f32 %v2888_v58, %v2890_v4  ;;  %v2211_v45 = vmul.f32 7.5, %v2203_v1  ;;  %v2218_v21 = vadd.f32 %v2882_v0, %v2210_v35 }
 0xe84   :  { %v2894_v52 = vpop.eup %2893 }
 0xe85   :  { %v2896_v60 = vpop.eup %2895  ;;  %v2212_v18 = vmul.f32 7.5, %v2204_v8  ;;  %v2219_v61 = vadd.f32 %v2886_v46, %v2211_v45  ;;  %v2205_v12 = vsub.f32 %v2892_v55, %v2894_v52 }
 0xe86   :  { %v2898_v57 = vpop.eup %2897 }
 0xe87   :  { %v2900_v62 = vpop.eup %2899  ;;  %v2220_v15 = vadd.f32 %v2890_v4, %v2212_v18  ;;  %v2623_v30 = vpack.c.bf16 %v2219_v61, %v2217_v9  ;;  %v2206_v13 = vsub.f32 %v2896_v60, %v2898_v57  ;;  %v2213_v14 = vmul.f32 7.5, %v2205_v12 }
 0xe88   :  { %v2902_v7 = vpop.eup %2901 }
 0xe89   :  { %v2904_v31 = vpop.eup %2903  ;;  %v2621_v63 = vpack.c.bf16 %v2220_v15, %v2218_v21  ;;  %v2207_v59 = vsub.f32 %v2900_v62, %v2902_v7  ;;  %v2214_v3 = vmul.f32 7.5, %v2206_v13  ;;  %v2221_v26 = vadd.f32 %v2894_v52, %v2213_v14 }
 0xe8a   :  { %v2906_v29 = vpop.eup %2905 }
 0xe8b   :  { %2622 = vmatprep.subr.bf16.mxu0 %v2621_v63  ;;  %v2208_v22 = vsub.f32 %v2904_v31, %v2906_v29  ;;  %v2215_v23 = vmul.f32 7.5, %v2207_v59  ;;  %v2222_v17 = vadd.f32 %v2898_v57, %v2214_v3  ;;  %v2908_v43 = vpop.eup %2907 }
 0xe8c   :  { %2624 = vmatpush1.bf16.msra.mxu0 %v2623_v30 }
 0xe8d   :  { %v2216_v6 = vmul.f32 7.5, %v2208_v22  ;;  %v2223_v11 = vadd.f32 %v2902_v7, %v2215_v23 }
 0xe8f   :  { %v2224_v24 = vadd.f32 %v2906_v29, %v2216_v6  ;;  %v2627_v20 = vpack.c.bf16 %v2223_v11, %v2221_v26 }
 0xe91   :  { %v2625_v34 = vpack.c.bf16 %v2224_v24, %v2222_v17 }
 0xe93   :  { %2626 = vmatprep.subr.bf16.mxu0 %v2625_v34 }
 0xe94   :  { %2628 = vmatpush1.bf16.msra.mxu0 %v2627_v20 }
 0xe97   :  { %2550 = vmatmul.mubr.msk.f32.vlgmr.msra.gmra.mrb[38].mxu0 %vm308_vm2, %v3498_v33 }
 0xe98   :  { %2420 = vmatprep.mubr.f32.mxu0 %v2977_v2  ;;  %v2319_v2 = vmul.f32 %v3517_v54, %v2309_v28 }
 0xf6a   :  { %v2291_v25 = vpop.f32.mrb[38].mxu0 }
 0xf6b   :  { %v2292_v27 = vadd.f32 %v2291_v25, %v3198_v5  ;;  %v2293_v39 = vpop.f32.mrb[39].mxu0 }
 0xf6c   :  { %v2294_v38 = vadd.f32 %v2293_v39, %v3198_v5  ;;  %v2321_v5 = vadd.f32 %v2320_v36, %v2319_v2 }
 0xf6d   :  { %v2297_v40 = vmul.f32 %v2292_v27, %v3639_v10  ;;  %v2312_v41 = vmul.f32 %v2311_v37, %v2292_v27 }
 0xf6e   :  { %v2298_v16 = vmul.f32 %v2294_v38, %v3639_v10  ;;  %v2313_v33 = vmul.f32 %v2311_v37, %v2294_v38  ;;  %v2328_v46 = vcombine.high %v2321_v5, %v2321_v5  ;;  %v2330_v10 = vmul.f32 %v2321_v5, %v3221_v47  ;;  %v2345_v47 = vpop.permute.xlu1 %2344 }
 0xf70   :  { %v2301_v51 = vcombine.low %v2297_v40, %v2298_v16  ;;  %v2316_v42 = vcombine.low %v2312_v41, %v2313_v33  ;;  %v2331_v4 = vmul.f32 %v2328_v46, %v3226_v50 }
 0xf72   :  { %v2303_v0 = vsub.f32 %v3659_v56, %v2301_v51  ;;  %v2339_v56 = vld [vmem:[%s3744_s11] sm:$0x7]  ;;  %s2979_s11 = smov [#allocation6]  }
 0xf73   :  { %s2450_s23 = sshll.u32 %s2979_s11, 4  ;;  %s2451_s23 = int_to_ptr.vmem [resolvable:$true] %s2450_s23 }
 0xf74   :  { %v2306_v44 = vmul.f32 %v2908_v43, %v2303_v0  ;;  %s2949_s24 = scalar_lea.vmem %s2451_s23, 128  ;;  %p2954_p11 = scmp.lt.s32.totalorder %s2451_s23, %s2451_s23 }
 0xf75   :  { %p2950_p10 = scmp.ne.s32.totalorder %s2451_s23, %s2949_s24  ;;  %p2955_p12 = scmp.lt.s32.totalorder %s2949_s24, %s2949_s24 }
 0xf76   :  { %v2551_v32 = vclamps-f32 %v2306_v44, 1.0 }
 0xf77   :  { %p2956_p13 = por %p2955_p12, %p2954_p11 }
 0xf78   :  { %v2310_v58 = vmul.f32 %v2551_v32, %v2309_v28 }
 0xf79   :  { %p2957_p0 = pnand %p2956_p13, %p2950_p10 }
 0xf7a   :  { %v2318_v1 = vadd.f32 %v2316_v42, %v2310_v58 }
 0xf7c   :  { %v2323_v19 = vcombine.high %v2318_v1, %v2318_v1  ;;  %v2325_v54 = vmul.f32 %v2318_v1, %v3224_v49 }
 0xf7e   :  { %v2326_v55 = vmul.f32 %v2323_v19, %v3228_v53  ;;  %v2332_v8 = vadd.f32 %v2330_v10, %v2325_v54 }
 0xf80   :  { %v2333_v35 = vadd.f32 %v2331_v4, %v2326_v55 }
 0xf82   :  { %v2336_v45 = vcombine.low %v2332_v8, %v2333_v35  ;;  %v2564_v52 = vcombine.low %v2333_v35, %v2333_v35 }
 0xf84   :  { %2552 = vmatprep.subr.msk.mxu0 %vm113_vm0, %v2564_v52 }
 0xf85   :  { %2553 = vmatpush1.msk.msra.mxu0 %vm113_vm0, %v2336_v45 }
 0xf86   :  { %2554 = vmatmul.mubr.msk.f32.vlgmr.msra.gmra.mrb[40].mxu0 %vm100_vm1, %v2339_v56 }
0x1059   :  { %v2422_v49 = vpop.f32.mrb[40].mxu0 }
0x105a   :  { %v2423_v60 = vadd.f32 %v2422_v49, %v2345_v47  ;;  %v2424_v50 = vpop.f32.mrb[41].mxu0 }
0x105b   :  { %v2425_v18 = vadd.f32 %v2424_v50, %v2345_v47 }
0x105c   :  { %v2555_v53 = vmul.f32 -1.442695, %v2423_v60 }
0x105d   :  { %v2556_v9 = vmul.f32 -1.442695, %v2425_v18 }
0x105e   :  { %2909 = vpow2.f32 %v2555_v53 }
0x105f   :  { %2911 = vpow2.f32 %v2556_v9 }
0x1068   :  { %v2910_v61 = vpop.eup %2909 }
0x1069   :  { %v2912_v12 = vpop.eup %2911  ;;  %v2433_v57 = vadd.f32 1.0, %v2910_v61 }
0x106a   :  { %v2434_v62 = vadd.f32 1.0, %v2912_v12 }
0x106b   :  { %2913 = vrcp.f32 %v2433_v57 }
0x106c   :  { %2915 = vrcp.f32 %v2434_v62 }
0x1075   :  { %v2914_v21 = vpop.eup %2913 }
0x1076   :  { %v2916_v15 = vpop.eup %2915 }
0x1077   :  { %v2441_v30 = vcombine.low %v2914_v21, %v2916_v15 }
0x1079   :  { %2443 = vst [vmem:[#allocation6] sm:$0x77] %v2441_v30 }
0x107a   :  { %2960 = shalt.err (!%p2957_p0)
}
0x107b   :  { %s2961_s8 = scalar_lea.hbm %s3746_s13, 128 }
0x107c   :  { %p2962_p1 = scmp.ne.s32.totalorder %s3746_s13, %s2961_s8  ;;  %p2965_p2 = scmp.lt.u32.totalorder %s2961_s8, %s3746_s13 }
0x107e   :  { %p2967_p3 = pnand %p2965_p2, %p2962_p1 }
0x1080   :  { %2970 = shalt.err (!%p2967_p3)
}
0x1081   :  { %2453 = dma.vmem_to_hbm [thread:$0]  %s2451_s23, 128, %s3746_s13, [#allocation7]  }
0x1082   :  { %2973 = dma.done.wait [#allocation7], 128  }
0x1083   :  { %2974 = vsyncadd [#allocation7], 4294967168 }
0x1084   :  { %2457 = vsyncpa [#allocation7], 1 }

</bundles_post_ra>
